<compile_context>
chip_gen: v5e
topology: v5e:2x2
jax: 0.10.0
libtpu: 0.0.40
codegen_flags: <defaults>
</compile_context>

<pallas_src>
import jax
import jax.numpy as jnp
from jax import lax
from jax.experimental import pallas as pl
from jax.experimental.pallas import tpu as pltpu

# ---- model / test configuration (consistent with the module's shape algebra:
#      dense_in = conv_dim_lstm*4 == 16 * (H/4) * (W/4)) ----------------------
B = 2
H = W = 16
C_CONV = 16                        # conv1 out channels (fixed to 16 in module)
CONV_DIM_OUT = 32
N_WIN = (H // 4) * (W // 4)        # 16 pooled spatial positions
D_FLAT = C_CONV * N_WIN            # 256 == conv_dim_lstm * 4 (dense in)
D_DENSE_OUT = CONV_DIM_OUT * 2     # 64
D_FCN = CONV_DIM_OUT               # 32
KD = 9                             # 3x3 conv taps
N_POOL = 4                         # 2x2 positions inside each max-pool window
DROPOUT_P = 0.1
KEEP = 1.0 / (1.0 - DROPOUT_P)     # eval-mode complex_dropout2d scale


# ----------------------------- fused kernel ---------------------------------
def _fused_kernel(xcat_ref, wcr_ref, wci_ref, bcr_ref, bci_ref,
                  wd_ref, bd_ref, w1_ref, b1_ref, w2_ref, b2_ref,
                  out_ref, feat_ref):
    # ---- ComplexConv2d as stacked im2col matmuls: rows = (p, win, b) = 128 --
    xcat = xcat_ref[...]                                    # (128, 18)
    zr = jnp.dot(xcat, wcr_ref[...],
                 preferred_element_type=jnp.float32) + bcr_ref[...]
    zi = jnp.dot(xcat, wci_ref[...],
                 preferred_element_type=jnp.float32) + bci_ref[...]
    # complex_relu
    zr = jnp.maximum(zr, 0.0)
    zi = jnp.maximum(zi, 0.0)

    # ---- complex_max_pool2d over the 4 pool positions: compare |z|^2,
    #      first max wins, single sqrt on the winner ----
    mag2 = zr * zr + zi * zi                                # (128, C)
    bw = B * N_WIN                                          # 32 rows per pos
    best2, best_r, best_i = mag2[0:bw], zr[0:bw], zi[0:bw]
    for p in range(1, N_POOL):
        lo, hi = p * bw, (p + 1) * bw
        m2 = mag2[lo:hi]
        take = m2 > best2
        best2 = jnp.where(take, m2, best2)
        best_r = jnp.where(take, zr[lo:hi], best_r)
        best_i = jnp.where(take, zi[lo:hi], best_i)
    best_abs = jnp.sqrt(best2)
    scale = best_abs * pl.reciprocal(best_abs + 1e-6, approx=True)
    pool_r = best_r * scale                                 # (32, C) row=win*B+b
    pool_i = best_i * scale

    # ---- lane-dense flatten into VMEM scratch: feat[b, win*C + c] (real),
    #      feat[b, 256 + win*C + c] (imag).  Dense weights were permuted on
    #      the host to this layout, so no in-kernel transpose is needed. ----
    for win in range(N_WIN):
        rows_r = pool_r[win * B:(win + 1) * B, :]           # (B, C)
        rows_i = pool_i[win * B:(win + 1) * B, :]
        feat_ref[:, win * C_CONV:(win + 1) * C_CONV] = rows_r
        feat_ref[:, D_FLAT + win * C_CONV:D_FLAT + (win + 1) * C_CONV] = rows_i

    x = feat_ref[...]                                       # (B, 512) = [xr|xi]

    # ---- complex MLP: each ComplexLinear is ONE block matmul with
    #      W = [[Wr, Wi], [-Wi, Wr]]; output is [zr | zi]. ----
    h = jnp.dot(x, wd_ref[...], preferred_element_type=jnp.float32) + bd_ref[...]
    h = jnp.maximum(h, 0.0) * KEEP                          # relu + dropout(eval)
    h = jnp.dot(h, w1_ref[...], preferred_element_type=jnp.float32) + b1_ref[...]
    h = jnp.maximum(h, 0.0) * KEEP
    z = jnp.dot(h, w2_ref[...], preferred_element_type=jnp.float32) + b2_ref[...]
    zr2 = z[:, :D_FCN]
    zi2 = z[:, D_FCN:]

    # softmax(|z|, dim=1)
    a = jnp.sqrt(zr2 * zr2 + zi2 * zi2)
    m = jnp.max(a, axis=1, keepdims=True)
    e = jnp.exp(a - m)
    s = jnp.sum(e, axis=1, keepdims=True)
    out_ref[...] = e * pl.reciprocal(s, approx=True)


# ----------------------------- host-side glue --------------------------------
def _build_patches(x_r, x_i):
    """(B,1,H,W) real/imag planes -> (4*N_WIN*B, 18) stacked im2col patches.

    Rows ordered (pool_pos p=dh*2+dw, window win=ph*4+pw, batch b); first 9
    columns are the real 3x3 taps, last 9 the imaginary taps.  Only static
    strided slices are used (no gather HLO)."""
    x = jnp.stack([x_r[:, 0], x_i[:, 0]], axis=0)           # (2, B, H, W)
    xp = jnp.pad(x, ((0, 0), (0, 0), (1, 1), (1, 1)))       # conv padding = 1
    oh, ow = H // 2, W // 2
    taps = jnp.stack(
        [xp[:, :, kh:kh + 2 * oh:2, kw:kw + 2 * ow:2]
         for kh in range(3) for kw in range(3)], axis=-1)   # (2, B, 8, 8, 9)
    groups = jnp.stack(
        [taps[:, :, dh::2, dw::2, :] for dh in range(2) for dw in range(2)],
        axis=0)                                             # (4, 2, B, 4, 4, 9)
    g = groups.reshape(N_POOL, 2, B, N_WIN, KD)
    g = jnp.transpose(g, (0, 3, 2, 1, 4))                   # (4, win, B, 2, 9)
    return g.reshape(N_POOL * N_WIN * B, 2 * KD)            # (128, 18)


def _linear_block(wr, wi, br, bi):
    """ComplexLinear (apply_complex) as one block matmul:
       [xr | xi] @ [[Wr^T, Wi^T], [-Wi^T, Wr^T]] + [br-bi | br+bi] = [zr | zi]."""
    wr_t, wi_t = wr.T, wi.T
    wblk = jnp.concatenate(
        [jnp.concatenate([wr_t, wi_t], axis=1),
         jnp.concatenate([-wi_t, wr_t], axis=1)], axis=0)
    bblk = jnp.concatenate([br - bi, br + bi]).reshape(1, -1)
    return wblk, bblk


def pack_params(p):
    """One-time host-side packing of torch-layout params into the MXU-friendly
    stacked / block forms consumed by the fused kernel."""
    # conv: (C,1,3,3) -> (9, C); stack real/imag taps to match the (128,18) LHS
    wr2 = p["conv_wr"].reshape(C_CONV, KD).T
    wi2 = p["conv_wi"].reshape(C_CONV, KD).T
    wc_r = jnp.concatenate([wr2, -wi2], axis=0)             # -> zr
    wc_i = jnp.concatenate([wi2, wr2], axis=0)              # -> zi
    bc_r = (p["conv_br"] - p["conv_bi"]).reshape(1, C_CONV)
    bc_i = (p["conv_br"] + p["conv_bi"]).reshape(1, C_CONV)

    # dense: permute torch's channel-major flatten index (c*N_WIN + win) to the
    # kernel's win-major layout (win*C + c).
    def perm(w):
        return (w.reshape(D_DENSE_OUT, C_CONV, N_WIN)
                 .transpose(0, 2, 1).reshape(D_DENSE_OUT, D_FLAT))

    wd, bd = _linear_block(perm(p["dense_wr"]), perm(p["dense_wi"]),
                           p["dense_br"], p["dense_bi"])
    w1, b1 = _linear_block(p["fcn1_wr"], p["fcn1_wi"],
                           p["fcn1_br"], p["fcn1_bi"])
    w2, b2 = _linear_block(p["fcn2_wr"], p["fcn2_wi"],
                           p["fcn2_br"], p["fcn2_bi"])
    return (wc_r, wc_i, bc_r, bc_i, wd, bd, w1, b1, w2, b2)


def forward(packed, x_r, x_i):
    """x_r, x_i: (B, 1, H, W) float32 — real/imag planes of the complex input."""
    xcat = _build_patches(x_r, x_i)
    return pl.pallas_call(
        _fused_kernel,
        out_shape=jax.ShapeDtypeStruct((B, D_FCN), jnp.float32),
        scratch_shapes=[pltpu.VMEM((B, 2 * D_FLAT), jnp.float32)],
    )(xcat, *packed)


# ----------------------------- parameters & reference ------------------------
def init_params(key):
    ks = jax.random.split(key, 16)
    s = 0.1
    n = jax.random.normal
    return {
        "conv_wr": s * n(ks[0], (C_CONV, 1, 3, 3), jnp.float32),
        "conv_wi": s * n(ks[1], (C_CONV, 1, 3, 3), jnp.float32),
        "conv_br": s * n(ks[2], (C_CONV,), jnp.float32),
        "conv_bi": s * n(ks[3], (C_CONV,), jnp.float32),
        "dense_wr": s * n(ks[4], (D_DENSE_OUT, D_FLAT), jnp.float32),
        "dense_wi": s * n(ks[5], (D_DENSE_OUT, D_FLAT), jnp.float32),
        "dense_br": s * n(ks[6], (D_DENSE_OUT,), jnp.float32),
        "dense_bi": s * n(ks[7], (D_DENSE_OUT,), jnp.float32),
        "fcn1_wr": s * n(ks[8], (D_FCN, D_DENSE_OUT), jnp.float32),
        "fcn1_wi": s * n(ks[9], (D_FCN, D_DENSE_OUT), jnp.float32),
        "fcn1_br": s * n(ks[10], (D_FCN,), jnp.float32),
        "fcn1_bi": s * n(ks[11], (D_FCN,), jnp.float32),
        "fcn2_wr": s * n(ks[12], (D_FCN, D_FCN), jnp.float32),
        "fcn2_wi": s * n(ks[13], (D_FCN, D_FCN), jnp.float32),
        "fcn2_br": s * n(ks[14], (D_FCN,), jnp.float32),
        "fcn2_bi": s * n(ks[15], (D_FCN,), jnp.float32),
    }


def ref_forward(params, x_r, x_i):
    """Straightforward JAX port of the PyTorch module (eval mode) used as an
    independent numerical check of the fused kernel."""
    hi = lax.Precision.HIGHEST

    def conv(x, w):
        return lax.conv_general_dilated(
            x, w, window_strides=(2, 2), padding=((1, 1), (1, 1)),
            dimension_numbers=("NCHW", "OIHW", "NCHW"), precision=hi)

    br = params["conv_br"].reshape(1, C_CONV, 1, 1)
    bi = params["conv_bi"].reshape(1, C_CONV, 1, 1)
    cr = conv(x_r, params["conv_wr"]) - conv(x_i, params["conv_wi"]) + br - bi
    ci = conv(x_i, params["conv_wr"]) + conv(x_r, params["conv_wi"]) + br + bi
    cr = jnp.maximum(cr, 0.0)
    ci = jnp.maximum(ci, 0.0)

    def windows(t):   # (B,C,8,8) -> (B,C,4,4,4); last dim = 2x2 window row-major
        return (t.reshape(B, C_CONV, H // 4, 2, W // 4, 2)
                 .transpose(0, 1, 2, 4, 3, 5)
                 .reshape(B, C_CONV, H // 4, W // 4, 4))

    aw = windows(jnp.sqrt(cr * cr + ci * ci))
    rw, iw = windows(cr), windows(ci)
    idx = jnp.argmax(aw, axis=-1)
    amax = jnp.max(aw, axis=-1)
    rsel = jnp.take_along_axis(rw, idx[..., None], axis=-1)[..., 0]
    isel = jnp.take_along_axis(iw, idx[..., None], axis=-1)[..., 0]
    denom = jnp.sqrt(rsel * rsel + isel * isel) + 1e-6
    fr = (amax * rsel / denom).reshape(B, -1)
    fi = (amax * isel / denom).reshape(B, -1)

    def clinear(xr, xi, wr, wi, br_, bi_):
        zr = (jnp.dot(xr, wr.T, precision=hi)
              - jnp.dot(xi, wi.T, precision=hi) + br_ - bi_)
        zi = (jnp.dot(xr, wi.T, precision=hi)
              + jnp.dot(xi, wr.T, precision=hi) + br_ + bi_)
        return zr, zi

    zr, zi = clinear(fr, fi, params["dense_wr"], params["dense_wi"],
                     params["dense_br"], params["dense_bi"])
    zr, zi = jnp.maximum(zr, 0.0) * KEEP, jnp.maximum(zi, 0.0) * KEEP
    zr, zi = clinear(zr, zi, params["fcn1_wr"], params["fcn1_wi"],
                     params["fcn1_br"], params["fcn1_bi"])
    zr, zi = jnp.maximum(zr, 0.0) * KEEP, jnp.maximum(zi, 0.0) * KEEP
    zr, zi = clinear(zr, zi, params["fcn2_wr"], params["fcn2_wi"],
                     params["fcn2_br"], params["fcn2_bi"])
    return jax.nn.softmax(jnp.sqrt(zr * zr + zi * zi), axis=1)


if __name__ == "__main__":
    key = jax.random.PRNGKey(0)
    k_p, k_xr, k_xi = jax.random.split(key, 3)
    params = init_params(k_p)
    packed = pack_params(params)       # one-time host-side block-weight packing
    x_r = jax.random.normal(k_xr, (B, 1, H, W), jnp.float32)
    x_i = jax.random.normal(k_xi, (B, 1, H, W), jnp.float32)

    out = jax.jit(forward)(packed, x_r, x_i)
    out = jax.block_until_ready(out)

    assert out.shape == (B, D_FCN), out.shape
    assert bool(jnp.all(jnp.isfinite(out)))
    assert bool(jnp.allclose(jnp.sum(out, axis=1), 1.0, atol=2e-3))
    ref = ref_forward(params, x_r, x_i)
    assert bool(jnp.allclose(out, ref, atol=2e-3)), \
        float(jnp.max(jnp.abs(out - ref)))
    print("KERNEL_OK")
</pallas_src>

<mosaic_0001>
module attributes {stable_mosaic.version = 11 : i64} {
  func.func @_fused_kernel(%arg0: memref<128x18xf32, #tpu.memory_space<vmem>>, %arg1: memref<18x16xf32, #tpu.memory_space<vmem>>, %arg2: memref<18x16xf32, #tpu.memory_space<vmem>>, %arg3: memref<1x16xf32, #tpu.memory_space<vmem>>, %arg4: memref<1x16xf32, #tpu.memory_space<vmem>>, %arg5: memref<512x128xf32, #tpu.memory_space<vmem>>, %arg6: memref<1x128xf32, #tpu.memory_space<vmem>>, %arg7: memref<128x64xf32, #tpu.memory_space<vmem>>, %arg8: memref<1x64xf32, #tpu.memory_space<vmem>>, %arg9: memref<64x64xf32, #tpu.memory_space<vmem>>, %arg10: memref<1x64xf32, #tpu.memory_space<vmem>>, %arg11: memref<2x32xf32, #tpu.memory_space<vmem>>, %arg12: memref<2x512xf32, #tpu.memory_space<vmem>>) attributes {dimension_semantics = [], scalar_prefetch = 0 : i64, scratch_operands = 1 : i64, tpu.core_type = #tpu.core_type<tc>} {
    %c0 = arith.constant 0 : index
    %c0_0 = arith.constant 0 : index
    %0 = vector.load %arg0[%c0, %c0_0] : memref<128x18xf32, #tpu.memory_space<vmem>>, vector<128x18xf32>
    %c0_1 = arith.constant 0 : index
    %c0_2 = arith.constant 0 : index
    %1 = vector.load %arg1[%c0_1, %c0_2] : memref<18x16xf32, #tpu.memory_space<vmem>>, vector<18x16xf32>
    %cst = arith.constant dense<0.000000e+00> : vector<128x16xf32>
    %2 = tpu.matmul %0, %1, %cst {dimension_numbers = #tpu.dot_dimension_numbers<[1], [0], [0], [1], [0, 0, 1, 1], [], []>} : vector<128x18xf32>, vector<18x16xf32>, vector<128x16xf32> -> vector<128x16xf32>
    %c0_3 = arith.constant 0 : index
    %c0_4 = arith.constant 0 : index
    %3 = vector.load %arg3[%c0_3, %c0_4] : memref<1x16xf32, #tpu.memory_space<vmem>>, vector<1x16xf32>
    %4 = vector.broadcast %3 : vector<1x16xf32> to vector<128x16xf32>
    %5 = arith.addf %2, %4 : vector<128x16xf32>
    %c0_5 = arith.constant 0 : index
    %c0_6 = arith.constant 0 : index
    %6 = vector.load %arg2[%c0_5, %c0_6] : memref<18x16xf32, #tpu.memory_space<vmem>>, vector<18x16xf32>
    %cst_7 = arith.constant dense<0.000000e+00> : vector<128x16xf32>
    %7 = tpu.matmul %0, %6, %cst_7 {dimension_numbers = #tpu.dot_dimension_numbers<[1], [0], [0], [1], [0, 0, 1, 1], [], []>} : vector<128x18xf32>, vector<18x16xf32>, vector<128x16xf32> -> vector<128x16xf32>
    %c0_8 = arith.constant 0 : index
    %c0_9 = arith.constant 0 : index
    %8 = vector.load %arg4[%c0_8, %c0_9] : memref<1x16xf32, #tpu.memory_space<vmem>>, vector<1x16xf32>
    %9 = vector.broadcast %8 : vector<1x16xf32> to vector<128x16xf32>
    %10 = arith.addf %7, %9 : vector<128x16xf32>
    %cst_10 = arith.constant 0.000000e+00 : f32
    %11 = vector.broadcast %cst_10 : f32 to vector<128x16xf32>
    %12 = arith.maximumf %5, %11 : vector<128x16xf32>
    %cst_11 = arith.constant 0.000000e+00 : f32
    %13 = vector.broadcast %cst_11 : f32 to vector<128x16xf32>
    %14 = arith.maximumf %10, %13 : vector<128x16xf32>
    %15 = arith.mulf %12, %12 : vector<128x16xf32>
    %16 = arith.mulf %14, %14 : vector<128x16xf32>
    %17 = arith.addf %15, %16 : vector<128x16xf32>
    %18 = vector.extract_strided_slice %17 {offsets = [0, 0], sizes = [32, 16], strides = [1, 1]} : vector<128x16xf32> to vector<32x16xf32>
    %19 = vector.extract_strided_slice %12 {offsets = [0, 0], sizes = [32, 16], strides = [1, 1]} : vector<128x16xf32> to vector<32x16xf32>
    %20 = vector.extract_strided_slice %14 {offsets = [0, 0], sizes = [32, 16], strides = [1, 1]} : vector<128x16xf32> to vector<32x16xf32>
    %21 = vector.extract_strided_slice %17 {offsets = [32, 0], sizes = [32, 16], strides = [1, 1]} : vector<128x16xf32> to vector<32x16xf32>
    %22 = arith.cmpf ogt, %21, %18 : vector<32x16xf32>
    %23 = arith.select %22, %21, %18 : vector<32x16xi1>, vector<32x16xf32>
    %24 = vector.extract_strided_slice %12 {offsets = [32, 0], sizes = [32, 16], strides = [1, 1]} : vector<128x16xf32> to vector<32x16xf32>
    %25 = arith.select %22, %24, %19 : vector<32x16xi1>, vector<32x16xf32>
    %26 = vector.extract_strided_slice %14 {offsets = [32, 0], sizes = [32, 16], strides = [1, 1]} : vector<128x16xf32> to vector<32x16xf32>
    %27 = arith.select %22, %26, %20 : vector<32x16xi1>, vector<32x16xf32>
    %28 = vector.extract_strided_slice %17 {offsets = [64, 0], sizes = [32, 16], strides = [1, 1]} : vector<128x16xf32> to vector<32x16xf32>
    %29 = arith.cmpf ogt, %28, %23 : vector<32x16xf32>
    %30 = arith.select %29, %28, %23 : vector<32x16xi1>, vector<32x16xf32>
    %31 = vector.extract_strided_slice %12 {offsets = [64, 0], sizes = [32, 16], strides = [1, 1]} : vector<128x16xf32> to vector<32x16xf32>
    %32 = arith.select %29, %31, %25 : vector<32x16xi1>, vector<32x16xf32>
    %33 = vector.extract_strided_slice %14 {offsets = [64, 0], sizes = [32, 16], strides = [1, 1]} : vector<128x16xf32> to vector<32x16xf32>
    %34 = arith.select %29, %33, %27 : vector<32x16xi1>, vector<32x16xf32>
    %35 = vector.extract_strided_slice %17 {offsets = [96, 0], sizes = [32, 16], strides = [1, 1]} : vector<128x16xf32> to vector<32x16xf32>
    %36 = arith.cmpf ogt, %35, %30 : vector<32x16xf32>
    %37 = arith.select %36, %35, %30 : vector<32x16xi1>, vector<32x16xf32>
    %38 = vector.extract_strided_slice %12 {offsets = [96, 0], sizes = [32, 16], strides = [1, 1]} : vector<128x16xf32> to vector<32x16xf32>
    %39 = arith.select %36, %38, %32 : vector<32x16xi1>, vector<32x16xf32>
    %40 = vector.extract_strided_slice %14 {offsets = [96, 0], sizes = [32, 16], strides = [1, 1]} : vector<128x16xf32> to vector<32x16xf32>
    %41 = arith.select %36, %40, %34 : vector<32x16xi1>, vector<32x16xf32>
    %42 = math.sqrt %37 : vector<32x16xf32>
    %cst_12 = arith.constant 9.99999997E-7 : f32
    %43 = vector.broadcast %cst_12 : f32 to vector<32x16xf32>
    %44 = arith.addf %42, %43 : vector<32x16xf32>
    %45 = tpu.reciprocal %44 {approx = true} : vector<32x16xf32> -> vector<32x16xf32>
    %46 = arith.mulf %42, %45 : vector<32x16xf32>
    %47 = arith.mulf %39, %46 : vector<32x16xf32>
    %48 = arith.mulf %41, %46 : vector<32x16xf32>
    %49 = vector.extract_strided_slice %47 {offsets = [0, 0], sizes = [2, 16], strides = [1, 1]} : vector<32x16xf32> to vector<2x16xf32>
    %50 = vector.extract_strided_slice %48 {offsets = [0, 0], sizes = [2, 16], strides = [1, 1]} : vector<32x16xf32> to vector<2x16xf32>
    %c0_13 = arith.constant 0 : index
    %c0_14 = arith.constant 0 : index
    %51 = vector.load %arg12[%c0_13, %c0_14] : memref<2x512xf32, #tpu.memory_space<vmem>>, vector<2x16xf32>
    tpu.vector_store %arg12[%c0_13, %c0_14], %49 {strides = array<i32>} : memref<2x512xf32, #tpu.memory_space<vmem>>, vector<2x16xf32>,
    %c0_15 = arith.constant 0 : index
    %c256 = arith.constant 256 : index
    %52 = vector.load %arg12[%c0_15, %c256] : memref<2x512xf32, #tpu.memory_space<vmem>>, vector<2x16xf32>
    tpu.vector_store %arg12[%c0_15, %c256], %50 {strides = array<i32>} : memref<2x512xf32, #tpu.memory_space<vmem>>, vector<2x16xf32>,
    %53 = vector.extract_strided_slice %47 {offsets = [2, 0], sizes = [2, 16], strides = [1, 1]} : vector<32x16xf32> to vector<2x16xf32>
    %54 = vector.extract_strided_slice %48 {offsets = [2, 0], sizes = [2, 16], strides = [1, 1]} : vector<32x16xf32> to vector<2x16xf32>
    %c0_16 = arith.constant 0 : index
    %c16 = arith.constant 16 : index
    %55 = vector.load %arg12[%c0_16, %c16] : memref<2x512xf32, #tpu.memory_space<vmem>>, vector<2x16xf32>
    tpu.vector_store %arg12[%c0_16, %c16], %53 {strides = array<i32>} : memref<2x512xf32, #tpu.memory_space<vmem>>, vector<2x16xf32>,
    %c0_17 = arith.constant 0 : index
    %c272 = arith.constant 272 : index
    %56 = vector.load %arg12[%c0_17, %c272] : memref<2x512xf32, #tpu.memory_space<vmem>>, vector<2x16xf32>
    tpu.vector_store %arg12[%c0_17, %c272], %54 {strides = array<i32>} : memref<2x512xf32, #tpu.memory_space<vmem>>, vector<2x16xf32>,
    %57 = vector.extract_strided_slice %47 {offsets = [4, 0], sizes = [2, 16], strides = [1, 1]} : vector<32x16xf32> to vector<2x16xf32>
    %58 = vector.extract_strided_slice %48 {offsets = [4, 0], sizes = [2, 16], strides = [1, 1]} : vector<32x16xf32> to vector<2x16xf32>
    %c0_18 = arith.constant 0 : index
    %c32 = arith.constant 32 : index
    %59 = vector.load %arg12[%c0_18, %c32] : memref<2x512xf32, #tpu.memory_space<vmem>>, vector<2x16xf32>
    tpu.vector_store %arg12[%c0_18, %c32], %57 {strides = array<i32>} : memref<2x512xf32, #tpu.memory_space<vmem>>, vector<2x16xf32>,
    %c0_19 = arith.constant 0 : index
    %c288 = arith.constant 288 : index
    %60 = vector.load %arg12[%c0_19, %c288] : memref<2x512xf32, #tpu.memory_space<vmem>>, vector<2x16xf32>
    tpu.vector_store %arg12[%c0_19, %c288], %58 {strides = array<i32>} : memref<2x512xf32, #tpu.memory_space<vmem>>, vector<2x16xf32>,
    %61 = vector.extract_strided_slice %47 {offsets = [6, 0], sizes = [2, 16], strides = [1, 1]} : vector<32x16xf32> to vector<2x16xf32>
    %62 = vector.extract_strided_slice %48 {offsets = [6, 0], sizes = [2, 16], strides = [1, 1]} : vector<32x16xf32> to vector<2x16xf32>
    %c0_20 = arith.constant 0 : index
    %c48 = arith.constant 48 : index
    %63 = vector.load %arg12[%c0_20, %c48] : memref<2x512xf32, #tpu.memory_space<vmem>>, vector<2x16xf32>
    tpu.vector_store %arg12[%c0_20, %c48], %61 {strides = array<i32>} : memref<2x512xf32, #tpu.memory_space<vmem>>, vector<2x16xf32>,
    %c0_21 = arith.constant 0 : index
    %c304 = arith.constant 304 : index
    %64 = vector.load %arg12[%c0_21, %c304] : memref<2x512xf32, #tpu.memory_space<vmem>>, vector<2x16xf32>
    tpu.vector_store %arg12[%c0_21, %c304], %62 {strides = array<i32>} : memref<2x512xf32, #tpu.memory_space<vmem>>, vector<2x16xf32>,
    %65 = vector.extract_strided_slice %47 {offsets = [8, 0], sizes = [2, 16], strides = [1, 1]} : vector<32x16xf32> to vector<2x16xf32>
    %66 = vector.extract_strided_slice %48 {offsets = [8, 0], sizes = [2, 16], strides = [1, 1]} : vector<32x16xf32> to vector<2x16xf32>
    %c0_22 = arith.constant 0 : index
    %c64 = arith.constant 64 : index
    %67 = vector.load %arg12[%c0_22, %c64] : memref<2x512xf32, #tpu.memory_space<vmem>>, vector<2x16xf32>
    tpu.vector_store %arg12[%c0_22, %c64], %65 {strides = array<i32>} : memref<2x512xf32, #tpu.memory_space<vmem>>, vector<2x16xf32>,
    %c0_23 = arith.constant 0 : index
    %c320 = arith.constant 320 : index
    %68 = vector.load %arg12[%c0_23, %c320] : memref<2x512xf32, #tpu.memory_space<vmem>>, vector<2x16xf32>
    tpu.vector_store %arg12[%c0_23, %c320], %66 {strides = array<i32>} : memref<2x512xf32, #tpu.memory_space<vmem>>, vector<2x16xf32>,
    %69 = vector.extract_strided_slice %47 {offsets = [10, 0], sizes = [2, 16], strides = [1, 1]} : vector<32x16xf32> to vector<2x16xf32>
    %70 = vector.extract_strided_slice %48 {offsets = [10, 0], sizes = [2, 16], strides = [1, 1]} : vector<32x16xf32> to vector<2x16xf32>
    %c0_24 = arith.constant 0 : index
    %c80 = arith.constant 80 : index
    %71 = vector.load %arg12[%c0_24, %c80] : memref<2x512xf32, #tpu.memory_space<vmem>>, vector<2x16xf32>
    tpu.vector_store %arg12[%c0_24, %c80], %69 {strides = array<i32>} : memref<2x512xf32, #tpu.memory_space<vmem>>, vector<2x16xf32>,
    %c0_25 = arith.constant 0 : index
    %c336 = arith.constant 336 : index
    %72 = vector.load %arg12[%c0_25, %c336] : memref<2x512xf32, #tpu.memory_space<vmem>>, vector<2x16xf32>
    tpu.vector_store %arg12[%c0_25, %c336], %70 {strides = array<i32>} : memref<2x512xf32, #tpu.memory_space<vmem>>, vector<2x16xf32>,
    %73 = vector.extract_strided_slice %47 {offsets = [12, 0], sizes = [2, 16], strides = [1, 1]} : vector<32x16xf32> to vector<2x16xf32>
    %74 = vector.extract_strided_slice %48 {offsets = [12, 0], sizes = [2, 16], strides = [1, 1]} : vector<32x16xf32> to vector<2x16xf32>
    %c0_26 = arith.constant 0 : index
    %c96 = arith.constant 96 : index
    %75 = vector.load %arg12[%c0_26, %c96] : memref<2x512xf32, #tpu.memory_space<vmem>>, vector<2x16xf32>
    tpu.vector_store %arg12[%c0_26, %c96], %73 {strides = array<i32>} : memref<2x512xf32, #tpu.memory_space<vmem>>, vector<2x16xf32>,
    %c0_27 = arith.constant 0 : index
    %c352 = arith.constant 352 : index
    %76 = vector.load %arg12[%c0_27, %c352] : memref<2x512xf32, #tpu.memory_space<vmem>>, vector<2x16xf32>
    tpu.vector_store %arg12[%c0_27, %c352], %74 {strides = array<i32>} : memref<2x512xf32, #tpu.memory_space<vmem>>, vector<2x16xf32>,
    %77 = vector.extract_strided_slice %47 {offsets = [14, 0], sizes = [2, 16], strides = [1, 1]} : vector<32x16xf32> to vector<2x16xf32>
    %78 = vector.extract_strided_slice %48 {offsets = [14, 0], sizes = [2, 16], strides = [1, 1]} : vector<32x16xf32> to vector<2x16xf32>
    %c0_28 = arith.constant 0 : index
    %c112 = arith.constant 112 : index
    %79 = vector.load %arg12[%c0_28, %c112] : memref<2x512xf32, #tpu.memory_space<vmem>>, vector<2x16xf32>
    tpu.vector_store %arg12[%c0_28, %c112], %77 {strides = array<i32>} : memref<2x512xf32, #tpu.memory_space<vmem>>, vector<2x16xf32>,
    %c0_29 = arith.constant 0 : index
    %c368 = arith.constant 368 : index
    %80 = vector.load %arg12[%c0_29, %c368] : memref<2x512xf32, #tpu.memory_space<vmem>>, vector<2x16xf32>
    tpu.vector_store %arg12[%c0_29, %c368], %78 {strides = array<i32>} : memref<2x512xf32, #tpu.memory_space<vmem>>, vector<2x16xf32>,
    %81 = vector.extract_strided_slice %47 {offsets = [16, 0], sizes = [2, 16], strides = [1, 1]} : vector<32x16xf32> to vector<2x16xf32>
    %82 = vector.extract_strided_slice %48 {offsets = [16, 0], sizes = [2, 16], strides = [1, 1]} : vector<32x16xf32> to vector<2x16xf32>
    %c0_30 = arith.constant 0 : index
    %c128 = arith.constant 128 : index
    %83 = vector.load %arg12[%c0_30, %c128] : memref<2x512xf32, #tpu.memory_space<vmem>>, vector<2x16xf32>
    tpu.vector_store %arg12[%c0_30, %c128], %81 {strides = array<i32>} : memref<2x512xf32, #tpu.memory_space<vmem>>, vector<2x16xf32>,
    %c0_31 = arith.constant 0 : index
    %c384 = arith.constant 384 : index
    %84 = vector.load %arg12[%c0_31, %c384] : memref<2x512xf32, #tpu.memory_space<vmem>>, vector<2x16xf32>
    tpu.vector_store %arg12[%c0_31, %c384], %82 {strides = array<i32>} : memref<2x512xf32, #tpu.memory_space<vmem>>, vector<2x16xf32>,
    %85 = vector.extract_strided_slice %47 {offsets = [18, 0], sizes = [2, 16], strides = [1, 1]} : vector<32x16xf32> to vector<2x16xf32>
    %86 = vector.extract_strided_slice %48 {offsets = [18, 0], sizes = [2, 16], strides = [1, 1]} : vector<32x16xf32> to vector<2x16xf32>
    %c0_32 = arith.constant 0 : index
    %c144 = arith.constant 144 : index
    %87 = vector.load %arg12[%c0_32, %c144] : memref<2x512xf32, #tpu.memory_space<vmem>>, vector<2x16xf32>
    tpu.vector_store %arg12[%c0_32, %c144], %85 {strides = array<i32>} : memref<2x512xf32, #tpu.memory_space<vmem>>, vector<2x16xf32>,
    %c0_33 = arith.constant 0 : index
    %c400 = arith.constant 400 : index
    %88 = vector.load %arg12[%c0_33, %c400] : memref<2x512xf32, #tpu.memory_space<vmem>>, vector<2x16xf32>
    tpu.vector_store %arg12[%c0_33, %c400], %86 {strides = array<i32>} : memref<2x512xf32, #tpu.memory_space<vmem>>, vector<2x16xf32>,
    %89 = vector.extract_strided_slice %47 {offsets = [20, 0], sizes = [2, 16], strides = [1, 1]} : vector<32x16xf32> to vector<2x16xf32>
    %90 = vector.extract_strided_slice %48 {offsets = [20, 0], sizes = [2, 16], strides = [1, 1]} : vector<32x16xf32> to vector<2x16xf32>
    %c0_34 = arith.constant 0 : index
    %c160 = arith.constant 160 : index
    %91 = vector.load %arg12[%c0_34, %c160] : memref<2x512xf32, #tpu.memory_space<vmem>>, vector<2x16xf32>
    tpu.vector_store %arg12[%c0_34, %c160], %89 {strides = array<i32>} : memref<2x512xf32, #tpu.memory_space<vmem>>, vector<2x16xf32>,
    %c0_35 = arith.constant 0 : index
    %c416 = arith.constant 416 : index
    %92 = vector.load %arg12[%c0_35, %c416] : memref<2x512xf32, #tpu.memory_space<vmem>>, vector<2x16xf32>
    tpu.vector_store %arg12[%c0_35, %c416], %90 {strides = array<i32>} : memref<2x512xf32, #tpu.memory_space<vmem>>, vector<2x16xf32>,
    %93 = vector.extract_strided_slice %47 {offsets = [22, 0], sizes = [2, 16], strides = [1, 1]} : vector<32x16xf32> to vector<2x16xf32>
    %94 = vector.extract_strided_slice %48 {offsets = [22, 0], sizes = [2, 16], strides = [1, 1]} : vector<32x16xf32> to vector<2x16xf32>
    %c0_36 = arith.constant 0 : index
    %c176 = arith.constant 176 : index
    %95 = vector.load %arg12[%c0_36, %c176] : memref<2x512xf32, #tpu.memory_space<vmem>>, vector<2x16xf32>
    tpu.vector_store %arg12[%c0_36, %c176], %93 {strides = array<i32>} : memref<2x512xf32, #tpu.memory_space<vmem>>, vector<2x16xf32>,
    %c0_37 = arith.constant 0 : index
    %c432 = arith.constant 432 : index
    %96 = vector.load %arg12[%c0_37, %c432] : memref<2x512xf32, #tpu.memory_space<vmem>>, vector<2x16xf32>
    tpu.vector_store %arg12[%c0_37, %c432], %94 {strides = array<i32>} : memref<2x512xf32, #tpu.memory_space<vmem>>, vector<2x16xf32>,
    %97 = vector.extract_strided_slice %47 {offsets = [24, 0], sizes = [2, 16], strides = [1, 1]} : vector<32x16xf32> to vector<2x16xf32>
    %98 = vector.extract_strided_slice %48 {offsets = [24, 0], sizes = [2, 16], strides = [1, 1]} : vector<32x16xf32> to vector<2x16xf32>
    %c0_38 = arith.constant 0 : index
    %c192 = arith.constant 192 : index
    %99 = vector.load %arg12[%c0_38, %c192] : memref<2x512xf32, #tpu.memory_space<vmem>>, vector<2x16xf32>
    tpu.vector_store %arg12[%c0_38, %c192], %97 {strides = array<i32>} : memref<2x512xf32, #tpu.memory_space<vmem>>, vector<2x16xf32>,
    %c0_39 = arith.constant 0 : index
    %c448 = arith.constant 448 : index
    %100 = vector.load %arg12[%c0_39, %c448] : memref<2x512xf32, #tpu.memory_space<vmem>>, vector<2x16xf32>
    tpu.vector_store %arg12[%c0_39, %c448], %98 {strides = array<i32>} : memref<2x512xf32, #tpu.memory_space<vmem>>, vector<2x16xf32>,
    %101 = vector.extract_strided_slice %47 {offsets = [26, 0], sizes = [2, 16], strides = [1, 1]} : vector<32x16xf32> to vector<2x16xf32>
    %102 = vector.extract_strided_slice %48 {offsets = [26, 0], sizes = [2, 16], strides = [1, 1]} : vector<32x16xf32> to vector<2x16xf32>
    %c0_40 = arith.constant 0 : index
    %c208 = arith.constant 208 : index
    %103 = vector.load %arg12[%c0_40, %c208] : memref<2x512xf32, #tpu.memory_space<vmem>>, vector<2x16xf32>
    tpu.vector_store %arg12[%c0_40, %c208], %101 {strides = array<i32>} : memref<2x512xf32, #tpu.memory_space<vmem>>, vector<2x16xf32>,
    %c0_41 = arith.constant 0 : index
    %c464 = arith.constant 464 : index
    %104 = vector.load %arg12[%c0_41, %c464] : memref<2x512xf32, #tpu.memory_space<vmem>>, vector<2x16xf32>
    tpu.vector_store %arg12[%c0_41, %c464], %102 {strides = array<i32>} : memref<2x512xf32, #tpu.memory_space<vmem>>, vector<2x16xf32>,
    %105 = vector.extract_strided_slice %47 {offsets = [28, 0], sizes = [2, 16], strides = [1, 1]} : vector<32x16xf32> to vector<2x16xf32>
    %106 = vector.extract_strided_slice %48 {offsets = [28, 0], sizes = [2, 16], strides = [1, 1]} : vector<32x16xf32> to vector<2x16xf32>
    %c0_42 = arith.constant 0 : index
    %c224 = arith.constant 224 : index
    %107 = vector.load %arg12[%c0_42, %c224] : memref<2x512xf32, #tpu.memory_space<vmem>>, vector<2x16xf32>
    tpu.vector_store %arg12[%c0_42, %c224], %105 {strides = array<i32>} : memref<2x512xf32, #tpu.memory_space<vmem>>, vector<2x16xf32>,
    %c0_43 = arith.constant 0 : index
    %c480 = arith.constant 480 : index
    %108 = vector.load %arg12[%c0_43, %c480] : memref<2x512xf32, #tpu.memory_space<vmem>>, vector<2x16xf32>
    tpu.vector_store %arg12[%c0_43, %c480], %106 {strides = array<i32>} : memref<2x512xf32, #tpu.memory_space<vmem>>, vector<2x16xf32>,
    %109 = vector.extract_strided_slice %47 {offsets = [30, 0], sizes = [2, 16], strides = [1, 1]} : vector<32x16xf32> to vector<2x16xf32>
    %110 = vector.extract_strided_slice %48 {offsets = [30, 0], sizes = [2, 16], strides = [1, 1]} : vector<32x16xf32> to vector<2x16xf32>
    %c0_44 = arith.constant 0 : index
    %c240 = arith.constant 240 : index
    %111 = vector.load %arg12[%c0_44, %c240] : memref<2x512xf32, #tpu.memory_space<vmem>>, vector<2x16xf32>
    tpu.vector_store %arg12[%c0_44, %c240], %109 {strides = array<i32>} : memref<2x512xf32, #tpu.memory_space<vmem>>, vector<2x16xf32>,
    %c0_45 = arith.constant 0 : index
    %c496 = arith.constant 496 : index
    %112 = vector.load %arg12[%c0_45, %c496] : memref<2x512xf32, #tpu.memory_space<vmem>>, vector<2x16xf32>
    tpu.vector_store %arg12[%c0_45, %c496], %110 {strides = array<i32>} : memref<2x512xf32, #tpu.memory_space<vmem>>, vector<2x16xf32>,
    %c0_46 = arith.constant 0 : index
    %c0_47 = arith.constant 0 : index
    %113 = vector.load %arg12[%c0_46, %c0_47] : memref<2x512xf32, #tpu.memory_space<vmem>>, vector<2x512xf32>
    %c0_48 = arith.constant 0 : index
    %c0_49 = arith.constant 0 : index
    %114 = vector.load %arg5[%c0_48, %c0_49] : memref<512x128xf32, #tpu.memory_space<vmem>>, vector<512x128xf32>
    %cst_50 = arith.constant dense<0.000000e+00> : vector<2x128xf32>
    %115 = tpu.matmul %113, %114, %cst_50 {dimension_numbers = #tpu.dot_dimension_numbers<[1], [0], [0], [1], [0, 0, 1, 1], [], []>} : vector<2x512xf32>, vector<512x128xf32>, vector<2x128xf32> -> vector<2x128xf32>
    %c0_51 = arith.constant 0 : index
    %c0_52 = arith.constant 0 : index
    %116 = vector.load %arg6[%c0_51, %c0_52] : memref<1x128xf32, #tpu.memory_space<vmem>>, vector<1x128xf32>
    %117 = vector.broadcast %116 : vector<1x128xf32> to vector<2x128xf32>
    %118 = arith.addf %115, %117 : vector<2x128xf32>
    %cst_53 = arith.constant 0.000000e+00 : f32
    %119 = vector.broadcast %cst_53 : f32 to vector<2x128xf32>
    %120 = arith.maximumf %118, %119 : vector<2x128xf32>
    %cst_54 = arith.constant 1.11111116 : f32
    %121 = vector.broadcast %cst_54 : f32 to vector<2x128xf32>
    %122 = arith.mulf %120, %121 : vector<2x128xf32>
    %c0_55 = arith.constant 0 : index
    %c0_56 = arith.constant 0 : index
    %123 = vector.load %arg7[%c0_55, %c0_56] : memref<128x64xf32, #tpu.memory_space<vmem>>, vector<128x64xf32>
    %cst_57 = arith.constant dense<0.000000e+00> : vector<2x64xf32>
    %124 = tpu.matmul %122, %123, %cst_57 {dimension_numbers = #tpu.dot_dimension_numbers<[1], [0], [0], [1], [0, 0, 1, 1], [], []>} : vector<2x128xf32>, vector<128x64xf32>, vector<2x64xf32> -> vector<2x64xf32>
    %c0_58 = arith.constant 0 : index
    %c0_59 = arith.constant 0 : index
    %125 = vector.load %arg8[%c0_58, %c0_59] : memref<1x64xf32, #tpu.memory_space<vmem>>, vector<1x64xf32>
    %126 = vector.broadcast %125 : vector<1x64xf32> to vector<2x64xf32>
    %127 = arith.addf %124, %126 : vector<2x64xf32>
    %cst_60 = arith.constant 0.000000e+00 : f32
    %128 = vector.broadcast %cst_60 : f32 to vector<2x64xf32>
    %129 = arith.maximumf %127, %128 : vector<2x64xf32>
    %cst_61 = arith.constant 1.11111116 : f32
    %130 = vector.broadcast %cst_61 : f32 to vector<2x64xf32>
    %131 = arith.mulf %129, %130 : vector<2x64xf32>
    %c0_62 = arith.constant 0 : index
    %c0_63 = arith.constant 0 : index
    %132 = vector.load %arg9[%c0_62, %c0_63] : memref<64x64xf32, #tpu.memory_space<vmem>>, vector<64x64xf32>
    %cst_64 = arith.constant dense<0.000000e+00> : vector<2x64xf32>
    %133 = tpu.matmul %131, %132, %cst_64 {dimension_numbers = #tpu.dot_dimension_numbers<[1], [0], [0], [1], [0, 0, 1, 1], [], []>} : vector<2x64xf32>, vector<64x64xf32>, vector<2x64xf32> -> vector<2x64xf32>
    %c0_65 = arith.constant 0 : index
    %c0_66 = arith.constant 0 : index
    %134 = vector.load %arg10[%c0_65, %c0_66] : memref<1x64xf32, #tpu.memory_space<vmem>>, vector<1x64xf32>
    %135 = vector.broadcast %134 : vector<1x64xf32> to vector<2x64xf32>
    %136 = arith.addf %133, %135 : vector<2x64xf32>
    %137 = vector.extract_strided_slice %136 {offsets = [0, 0], sizes = [2, 32], strides = [1, 1]} : vector<2x64xf32> to vector<2x32xf32>
    %138 = vector.extract_strided_slice %136 {offsets = [0, 32], sizes = [2, 32], strides = [1, 1]} : vector<2x64xf32> to vector<2x32xf32>
    %139 = arith.mulf %137, %137 : vector<2x32xf32>
    %140 = arith.mulf %138, %138 : vector<2x32xf32>
    %141 = arith.addf %139, %140 : vector<2x32xf32>
    %142 = math.sqrt %141 : vector<2x32xf32>
    %cst_67 = arith.constant dense<0xFF800000> : vector<2xf32>
    %143 = vector.multi_reduction <maximumf>, %142, %cst_67 [1] : vector<2x32xf32> to vector<2xf32>
    %144 = vector.shape_cast %143 : vector<2xf32> to vector<2x1xf32>
    %145 = vector.broadcast %144 : vector<2x1xf32> to vector<2x32xf32>
    %146 = arith.subf %142, %145 : vector<2x32xf32>
    %147 = math.exp %146 : vector<2x32xf32>
    %cst_68 = arith.constant dense<0.000000e+00> : vector<2xf32>
    %148 = vector.multi_reduction <add>, %147, %cst_68 [1] : vector<2x32xf32> to vector<2xf32>
    %149 = vector.shape_cast %148 : vector<2xf32> to vector<2x1xf32>
    %150 = tpu.reciprocal %149 {approx = true} : vector<2x1xf32> -> vector<2x1xf32>
    %151 = vector.broadcast %150 : vector<2x1xf32> to vector<2x32xf32>
    %152 = arith.mulf %147, %151 : vector<2x32xf32>
    %c0_69 = arith.constant 0 : index
    %c0_70 = arith.constant 0 : index
    %153 = vector.load %arg11[%c0_69, %c0_70] : memref<2x32xf32, #tpu.memory_space<vmem>>, vector<2x32xf32>
    tpu.vector_store %arg11[%c0_69, %c0_70], %152 {strides = array<i32>} : memref<2x32xf32, #tpu.memory_space<vmem>>, vector<2x32xf32>,
    return
  }
}

</mosaic_0001>

<bundles_post_ra>
// kernel: forward.1
= control target key start
LH: loop header
LB: loop body
LE: loop exit
PB: predicated region body
PF: predicated region fallthrough
CT: control target
= control target key end

     0   :  { %vm111_vm0 = vcmask 1041408   ;;  %vm62_vm1 = vcmask 146432   ;;  %s1703_s0 = inlined_call_operand.vmem [shape: f32[128,18], index: 0, kind: input, shape index: {}]   ;;  %s1704_s1 = inlined_call_operand.vmem [shape: f32[18,16], index: 1, kind: input, shape index: {}]   ;;  %s1705_s2 = inlined_call_operand.vmem [shape: f32[18,16], index: 2, kind: input, shape index: {}]   ;;  %s1706_s3 = inlined_call_operand.vmem [shape: f32[1,16], index: 3, kind: input, shape index: {}]   ;;  %s1707_s4 = inlined_call_operand.vmem [shape: f32[1,16], index: 4, kind: input, shape index: {}]   ;;  %s1708_s5 = inlined_call_operand.vmem [shape: f32[512,128], index: 5, kind: input, shape index: {}]   ;;  %s1709_s6 = inlined_call_operand.vmem [shape: f32[1,128], index: 6, kind: input, shape index: {}]   ;;  %s1710_s7 = inlined_call_operand.vmem [shape: f32[128,64], index: 7, kind: input, shape index: {}]   ;;  %s1711_s8 = inlined_call_operand.vmem [shape: f32[1,64], index: 8, kind: input, shape index: {}]   ;;  %s1712_s9 = inlined_call_operand.vmem [shape: f32[64,64], index: 9, kind: input, shape index: {}]   ;;  %s1713_s10 = inlined_call_operand.vmem [shape: f32[1,64], index: 10, kind: input, shape index: {}]   ;;  %s1714_s11 = inlined_call_operand.hbm [shape: f32[2,32], index: 11, kind: output, shape index: {}]  }
   0x1   :  { %v57_v0 = vld [vmem:[%s1704_s1 + $0x10] sm:$0x3]  ;;  %v56_v2 = vld [vmem:[%s1704_s1 + $0x8] sm:$0xff]  ;;  %v55_v4 = vld [vmem:[%s1704_s1] sm:$0xff] }
   0x2   :  { %v182_v1 = vld [vmem:[%s1705_s2 + $0x10] sm:$0x3]  ;;  %941 = vmatpush.msk.msra.mxu0 %vm111_vm0, %v57_v0  ;;  %v181_v3 = vld [vmem:[%s1705_s2 + $0x8] sm:$0xff]  ;;  %v180_v5 = vld [vmem:[%s1705_s2] sm:$0xff] }
   0x3   :  { %958 = vmatpush.msk.msra.mxu1 %vm111_vm0, %v182_v1  ;;  %v39_v6 = vld [vmem:[%s1703_s0] sm:$0xff] }
   0x4   :  { %129 = vmatpush.msra.mxu0 %v56_v2 }
   0x5   :  { %204 = vmatpush.msra.mxu1 %v181_v3 }
   0x6   :  { %130 = vmatpush.msra.mxu0 %v55_v4 }
   0x7   :  { %205 = vmatpush.msra.mxu1 %v180_v5 }
   0x8   :  { %16 = vsyncpa [#allocation4], 0  ;;  %942 = vmatmul.msk.f32.vlgmr.msra.gmra.mxu0 %vm62_vm1, %v39_v6  ;;  %959 = vmatmul.msk.f32.vlgmr.msra.gmra.mxu1 %vm62_vm1, %v39_v6  ;;  %v40_v7 = vld [vmem:[%s1703_s0 + $0x8] sm:$0xff]  ;;  %v41_v8 = vld [vmem:[%s1703_s0 + $0x10] sm:$0xff]  ;;  %s1040_s23 = smov 48   ;;  %s1041_s24 = smov 80  }
   0x9   :  { %v42_v9 = vld [vmem:[%s1703_s0 + $0x18] sm:$0xff]  ;;  %v43_v10 = vld [vmem:[%s1703_s0 + $0x20] sm:$0xff]  ;;  %v44_v11 = vld [vmem:[%s1703_s0 + $0x28] sm:$0xff]  ;;  %s1042_s25 = smov 96   ;;  %s1043_s26 = smov 112  }
   0xa   :  { %v45_v12 = vld [vmem:[%s1703_s0 + $0x30] sm:$0xff]  ;;  %v46_v13 = vld [vmem:[%s1703_s0 + $0x38] sm:$0xff]  ;;  %v47_v14 = vld [vmem:[%s1703_s0 + $0x40] sm:$0xff] }
   0xb   :  { %v48_v15 = vld [vmem:[%s1703_s0 + $0x48] sm:$0xff]  ;;  %v49_v16 = vld [vmem:[%s1703_s0 + $0x50] sm:$0xff]  ;;  %v50_v17 = vld [vmem:[%s1703_s0 + $0x58] sm:$0xff] }
   0xc   :  { %v51_v18 = vld [vmem:[%s1703_s0 + $0x60] sm:$0xff]  ;;  %v52_v19 = vld [vmem:[%s1703_s0 + $0x68] sm:$0xff]  ;;  %v53_v20 = vld [vmem:[%s1703_s0 + $0x70] sm:$0xff] }
   0xd   :  { %v54_v21 = vld [vmem:[%s1703_s0 + $0x78] sm:$0xff]  ;;  %v1206_v22 = vld [vmem:[%s1706_s3] ss:$0 sm:$0xff]  ;;  %s1037_s0 = smov 16   ;;  %s1038_s3 = smov 64  }
   0xe   :  { %v1211_v23 = vld [vmem:[%s1707_s4] ss:$0 sm:$0xff]  ;;  %s1039_s4 = smov 32  }
  0x10   :  { %943 = vmatmul.msk.f32.gmra.mxu0 %vm62_vm1, %v40_v7  ;;  %960 = vmatmul.msk.f32.gmra.mxu1 %vm62_vm1, %v40_v7 }
  0x18   :  { %944 = vmatmul.msk.f32.gmra.mxu0 %vm62_vm1, %v41_v8  ;;  %961 = vmatmul.msk.f32.gmra.mxu1 %vm62_vm1, %v41_v8 }
  0x20   :  { %945 = vmatmul.msk.f32.gmra.mxu0 %vm62_vm1, %v42_v9  ;;  %962 = vmatmul.msk.f32.gmra.mxu1 %vm62_vm1, %v42_v9 }
  0x28   :  { %946 = vmatmul.msk.f32.gmra.mxu0 %vm62_vm1, %v43_v10  ;;  %963 = vmatmul.msk.f32.gmra.mxu1 %vm62_vm1, %v43_v10 }
  0x30   :  { %947 = vmatmul.msk.f32.gmra.mxu0 %vm62_vm1, %v44_v11  ;;  %964 = vmatmul.msk.f32.gmra.mxu1 %vm62_vm1, %v44_v11 }
  0x38   :  { %948 = vmatmul.msk.f32.gmra.mxu0 %vm62_vm1, %v45_v12  ;;  %965 = vmatmul.msk.f32.gmra.mxu1 %vm62_vm1, %v45_v12 }
  0x40   :  { %949 = vmatmul.msk.f32.gmra.mxu0 %vm62_vm1, %v46_v13  ;;  %966 = vmatmul.msk.f32.gmra.mxu1 %vm62_vm1, %v46_v13 }
  0x48   :  { %950 = vmatmul.msk.f32.gmra.mxu0 %vm62_vm1, %v47_v14  ;;  %967 = vmatmul.msk.f32.gmra.mxu1 %vm62_vm1, %v47_v14 }
  0x50   :  { %951 = vmatmul.msk.f32.gmra.mxu0 %vm62_vm1, %v48_v15  ;;  %968 = vmatmul.msk.f32.gmra.mxu1 %vm62_vm1, %v48_v15 }
  0x58   :  { %952 = vmatmul.msk.f32.gmra.mxu0 %vm62_vm1, %v49_v16  ;;  %969 = vmatmul.msk.f32.gmra.mxu1 %vm62_vm1, %v49_v16 }
  0x60   :  { %953 = vmatmul.msk.f32.gmra.mxu0 %vm62_vm1, %v50_v17  ;;  %970 = vmatmul.msk.f32.gmra.mxu1 %vm62_vm1, %v50_v17 }
  0x68   :  { %954 = vmatmul.msk.f32.gmra.mxu0 %vm62_vm1, %v51_v18  ;;  %971 = vmatmul.msk.f32.gmra.mxu1 %vm62_vm1, %v51_v18 }
  0x70   :  { %955 = vmatmul.msk.f32.gmra.mxu0 %vm62_vm1, %v52_v19  ;;  %972 = vmatmul.msk.f32.gmra.mxu1 %vm62_vm1, %v52_v19 }
  0x78   :  { %956 = vmatmul.msk.f32.gmra.mxu0 %vm62_vm1, %v53_v20  ;;  %973 = vmatmul.msk.f32.gmra.mxu1 %vm62_vm1, %v53_v20 }
  0x80   :  { %957 = vmatmul.msk.f32.gmra.mxu0 %vm62_vm1, %v54_v21  ;;  %974 = vmatmul.msk.f32.gmra.mxu1 %vm62_vm1, %v54_v21 }
  0x85   :  { %v132_v24 = vpop.f32.mrf.mxu0  ;;  %v207_v25 = vpop.f32.mrf.mxu1 }
  0x86   :  { %v133_v26 = vadd.f32 %v1206_v22, %v132_v24  ;;  %v208_v27 = vadd.f32 %v1211_v23, %v207_v25 }
  0x88   :  { %v255_v28 = vmax.f32 %v133_v26, 0.0  ;;  %v271_v29 = vmax.f32 %v208_v27, 0.0 }
  0x8a   :  { %v287_v30 = vmul.f32 %v255_v28, %v255_v28  ;;  %v303_v31 = vmul.f32 %v271_v29, %v271_v29 }
  0x8c   :  { %v1215_v32 = vadd.f32 %v303_v31, %v287_v30 }
  0x8d   :  { %v135_v33 = vpop.f32.mrf.mxu0  ;;  %v210_v34 = vpop.f32.mrf.mxu1 }
  0x8e   :  { %v136_v35 = vadd.f32 %v1206_v22, %v135_v33  ;;  %v211_v36 = vadd.f32 %v1211_v23, %v210_v34 }
  0x90   :  { %v256_v37 = vmax.f32 %v136_v35, 0.0  ;;  %v272_v38 = vmax.f32 %v211_v36, 0.0 }
  0x92   :  { %v288_v39 = vmul.f32 %v256_v37, %v256_v37  ;;  %v304_v40 = vmul.f32 %v272_v38, %v272_v38 }
  0x94   :  { %v1219_v41 = vadd.f32 %v304_v40, %v288_v39 }
  0x95   :  { %v138_v42 = vpop.f32.mrf.mxu0  ;;  %v213_v43 = vpop.f32.mrf.mxu1 }
  0x96   :  { %v139_v44 = vadd.f32 %v1206_v22, %v138_v42  ;;  %v214_v45 = vadd.f32 %v1211_v23, %v213_v43 }
  0x98   :  { %v257_v46 = vmax.f32 %v139_v44, 0.0  ;;  %v273_v47 = vmax.f32 %v214_v45, 0.0 }
  0x9a   :  { %v289_v48 = vmul.f32 %v257_v46, %v257_v46  ;;  %v305_v49 = vmul.f32 %v273_v47, %v273_v47 }
  0x9c   :  { %v1223_v50 = vadd.f32 %v305_v49, %v289_v48 }
  0x9d   :  { %v141_v51 = vpop.f32.mrf.mxu0  ;;  %v216_v52 = vpop.f32.mrf.mxu1 }
  0x9e   :  { %v142_v53 = vadd.f32 %v1206_v22, %v141_v51  ;;  %v217_v54 = vadd.f32 %v1211_v23, %v216_v52 }
  0xa0   :  { %v258_v55 = vmax.f32 %v142_v53, 0.0  ;;  %v274_v56 = vmax.f32 %v217_v54, 0.0 }
  0xa2   :  { %v290_v57 = vmul.f32 %v258_v55, %v258_v55  ;;  %v306_v58 = vmul.f32 %v274_v56, %v274_v56 }
  0xa4   :  { %v322_v59 = vadd.f32 %v306_v58, %v290_v57 }
  0xa5   :  { %v144_v60 = vpop.f32.mrf.mxu0  ;;  %v219_v61 = vpop.f32.mrf.mxu1 }
  0xa6   :  { %v145_v62 = vadd.f32 %v1206_v22, %v144_v60  ;;  %v220_v63 = vadd.f32 %v1211_v23, %v219_v61 }
  0xa8   :  { %v259_v0 = vmax.f32 %v145_v62, 0.0  ;;  %v275_v1 = vmax.f32 %v220_v63, 0.0 }
  0xaa   :  { %v291_v2 = vmul.f32 %v259_v0, %v259_v0  ;;  %v307_v3 = vmul.f32 %v275_v1, %v275_v1 }
  0xac   :  { %v323_v4 = vadd.f32 %v307_v3, %v291_v2 }
  0xad   :  { %v147_v5 = vpop.f32.mrf.mxu0  ;;  %v222_v6 = vpop.f32.mrf.mxu1 }
  0xae   :  { %vm335_vm2 = vcmp.gt.f32.partialorder %v323_v4, %v1215_v32  ;;  %v148_v7 = vadd.f32 %v1206_v22, %v147_v5  ;;  %v223_v8 = vadd.f32 %v1211_v23, %v222_v6 }
  0xaf   :  { %v343_v9 = vsel %vm335_vm2, %v259_v0, %v255_v28  ;;  %v347_v10 = vsel %vm335_vm2, %v275_v1, %v271_v29  ;;  %v339_v57 = vsel %vm335_vm2, %v323_v4, %v1215_v32  ;;  %vm451_vm2 = vcmask 123904  }
  0xb0   :  { %v260_v11 = vmax.f32 %v148_v7, 0.0  ;;  %v276_v12 = vmax.f32 %v223_v8, 0.0 }
  0xb2   :  { %v292_v13 = vmul.f32 %v260_v11, %v260_v11  ;;  %v308_v14 = vmul.f32 %v276_v12, %v276_v12 }
  0xb4   :  { %v324_v15 = vadd.f32 %v308_v14, %v292_v13 }
  0xb5   :  { %v150_v16 = vpop.f32.mrf.mxu0  ;;  %v225_v17 = vpop.f32.mrf.mxu1 }
  0xb6   :  { %vm336_vm3 = vcmp.gt.f32.partialorder %v324_v15, %v1219_v41  ;;  %v151_v18 = vadd.f32 %v1206_v22, %v150_v16  ;;  %v226_v19 = vadd.f32 %v1211_v23, %v225_v17 }
  0xb7   :  { %v344_v20 = vsel %vm336_vm3, %v260_v11, %v256_v37  ;;  %v348_v21 = vsel %vm336_vm3, %v276_v12, %v272_v38  ;;  %v340_v32 = vsel %vm336_vm3, %v324_v15, %v1219_v41 }
  0xb8   :  { %v261_v24 = vmax.f32 %v151_v18, 0.0  ;;  %v277_v25 = vmax.f32 %v226_v19, 0.0 }
  0xba   :  { %v293_v26 = vmul.f32 %v261_v24, %v261_v24  ;;  %v309_v27 = vmul.f32 %v277_v25, %v277_v25 }
  0xbc   :  { %v325_v28 = vadd.f32 %v309_v27, %v293_v26 }
  0xbd   :  { %v153_v29 = vpop.f32.mrf.mxu0  ;;  %v228_v30 = vpop.f32.mrf.mxu1 }
  0xbe   :  { %vm337_vm4 = vcmp.gt.f32.partialorder %v325_v28, %v1223_v50  ;;  %v154_v31 = vadd.f32 %v1206_v22, %v153_v29  ;;  %v229_v33 = vadd.f32 %v1211_v23, %v228_v30 }
  0xbf   :  { %v345_v34 = vsel %vm337_vm4, %v261_v24, %v257_v46  ;;  %v349_v35 = vsel %vm337_vm4, %v277_v25, %v273_v47  ;;  %v341_v41 = vsel %vm337_vm4, %v325_v28, %v1223_v50 }
  0xc0   :  { %v262_v36 = vmax.f32 %v154_v31, 0.0  ;;  %v278_v37 = vmax.f32 %v229_v33, 0.0 }
  0xc2   :  { %v294_v38 = vmul.f32 %v262_v36, %v262_v36  ;;  %v310_v39 = vmul.f32 %v278_v37, %v278_v37 }
  0xc4   :  { %v326_v40 = vadd.f32 %v310_v39, %v294_v38 }
  0xc5   :  { %v156_v42 = vpop.f32.mrf.mxu0  ;;  %v231_v43 = vpop.f32.mrf.mxu1 }
  0xc6   :  { %vm338_vm5 = vcmp.gt.f32.partialorder %v326_v40, %v322_v59  ;;  %v157_v44 = vadd.f32 %v1206_v22, %v156_v42  ;;  %v232_v45 = vadd.f32 %v1211_v23, %v231_v43 }
  0xc7   :  { %v346_v48 = vsel %vm338_vm5, %v262_v36, %v258_v55  ;;  %v350_v49 = vsel %vm338_vm5, %v278_v37, %v274_v56  ;;  %v1252_v51 = vsel %vm338_vm5, %v326_v40, %v322_v59 }
  0xc8   :  { %v263_v46 = vmax.f32 %v157_v44, 0.0  ;;  %v279_v52 = vmax.f32 %v232_v45, 0.0 }
  0xca   :  { %v295_v53 = vmul.f32 %v263_v46, %v263_v46  ;;  %v311_v47 = vmul.f32 %v279_v52, %v279_v52 }
  0xcc   :  { %v327_v54 = vadd.f32 %v311_v47, %v295_v53 }
  0xcd   :  { %v159_v58 = vpop.f32.mrf.mxu0  ;;  %v234_v60 = vpop.f32.mrf.mxu1 }
  0xce   :  { %vm351_vm6 = vcmp.gt.f32.partialorder %v327_v54, %v339_v57  ;;  %v160_v61 = vadd.f32 %v1206_v22, %v159_v58  ;;  %v235_v62 = vadd.f32 %v1211_v23, %v234_v60 }
  0xcf   :  { %v359_v55 = vsel %vm351_vm6, %v263_v46, %v343_v9  ;;  %v363_v56 = vsel %vm351_vm6, %v279_v52, %v347_v10  ;;  %v355_v38 = vsel %vm351_vm6, %v327_v54, %v339_v57 }
  0xd0   :  { %v264_v59 = vmax.f32 %v160_v61, 0.0  ;;  %v280_v63 = vmax.f32 %v235_v62, 0.0 }
  0xd2   :  { %v296_v0 = vmul.f32 %v264_v59, %v264_v59  ;;  %v312_v1 = vmul.f32 %v280_v63, %v280_v63 }
  0xd4   :  { %v328_v2 = vadd.f32 %v312_v1, %v296_v0 }
  0xd5   :  { %v162_v3 = vpop.f32.mrf.mxu0  ;;  %v237_v4 = vpop.f32.mrf.mxu1 }
  0xd6   :  { %vm352_vm7 = vcmp.gt.f32.partialorder %v328_v2, %v340_v32  ;;  %v163_v5 = vadd.f32 %v1206_v22, %v162_v3  ;;  %v238_v6 = vadd.f32 %v1211_v23, %v237_v4 }
  0xd7   :  { %v1267_v7 = vsel %vm352_vm7, %v264_v59, %v344_v20  ;;  %v364_v8 = vsel %vm352_vm7, %v280_v63, %v348_v21  ;;  %v356_v60 = vsel %vm352_vm7, %v328_v2, %v340_v32  ;;  %vm461_vm7 = vcmask 255104  }
  0xd8   :  { %v265_v9 = vmax.f32 %v163_v5, 0.0  ;;  %v281_v10 = vmax.f32 %v238_v6, 0.0 }
  0xda   :  { %v297_v11 = vmul.f32 %v265_v9, %v265_v9  ;;  %v313_v12 = vmul.f32 %v281_v10, %v281_v10 }
  0xdc   :  { %v329_v13 = vadd.f32 %v313_v12, %v297_v11 }
  0xdd   :  { %v165_v14 = vpop.f32.mrf.mxu0  ;;  %v240_v15 = vpop.f32.mrf.mxu1 }
  0xde   :  { %vm353_vm8 = vcmp.gt.f32.partialorder %v329_v13, %v341_v41  ;;  %v166_v16 = vadd.f32 %v1206_v22, %v165_v14  ;;  %v241_v17 = vadd.f32 %v1211_v23, %v240_v15 }
  0xdf   :  { %v1276_v18 = vsel %vm353_vm8, %v265_v9, %v345_v34  ;;  %v1279_v19 = vsel %vm353_vm8, %v281_v10, %v349_v35  ;;  %v357_v9 = vsel %vm353_vm8, %v329_v13, %v341_v41  ;;  %vm477_vm8 = vcmask 386304  }
  0xe0   :  { %v266_v20 = vmax.f32 %v166_v16, 0.0  ;;  %v282_v21 = vmax.f32 %v241_v17, 0.0 }
  0xe2   :  { %v298_v24 = vmul.f32 %v266_v20, %v266_v20  ;;  %v314_v25 = vmul.f32 %v282_v21, %v282_v21 }
  0xe4   :  { %v1281_v26 = vadd.f32 %v314_v25, %v298_v24 }
  0xe5   :  { %v168_v50 = vpop.f32.mrf.mxu0  ;;  %v243_v27 = vpop.f32.mrf.mxu1 }
  0xe6   :  { %vm354_vm9 = vcmp.gt.f32.partialorder %v1281_v26, %v1252_v51  ;;  %v169_v28 = vadd.f32 %v1206_v22, %v168_v50  ;;  %v244_v29 = vadd.f32 %v1211_v23, %v243_v27 }
  0xe7   :  { %v1290_v30 = vsel %vm354_vm9, %v266_v20, %v346_v48  ;;  %v1295_v31 = vsel %vm354_vm9, %v282_v21, %v350_v49 }
  0xe8   :  { %v267_v33 = vmax.f32 %v169_v28, 0.0  ;;  %v283_v34 = vmax.f32 %v244_v29, 0.0 }
  0xea   :  { %v299_v35 = vmul.f32 %v267_v33, %v267_v33  ;;  %v315_v36 = vmul.f32 %v283_v34, %v283_v34 }
  0xec   :  { %v331_v37 = vadd.f32 %v315_v36, %v299_v35 }
  0xed   :  { %v171_v39 = vpop.f32.mrf.mxu0  ;;  %v246_v40 = vpop.f32.mrf.mxu1 }
  0xee   :  { %vm367_vm10 = vcmp.gt.f32.partialorder %v331_v37, %v355_v38  ;;  %v172_v42 = vadd.f32 %v1206_v22, %v171_v39  ;;  %v247_v43 = vadd.f32 %v1211_v23, %v246_v40 }
  0xef   :  { %v371_v44 = vsel %vm367_vm10, %v331_v37, %v355_v38  ;;  %v1300_v45 = vsel %vm367_vm10, %v267_v33, %v359_v55  ;;  %v1302_v48 = vsel %vm367_vm10, %v283_v34, %v363_v56  ;;  %vm505_vm10 = vcmask 648704  }
  0xf0   :  { %989 = vrsqrt.f32 %v371_v44  ;;  %v268_v49 = vmax.f32 %v172_v42, 0.0  ;;  %v284_v46 = vmax.f32 %v247_v43, 0.0  ;;  %vm390_vm13 = vcmp.eq.f32.partialorder %v371_v44, inf }
  0xf1   :  { %v393_v24 = vand.u32 2147483648, %v371_v44  ;;  %vm392_vm14 = vcmp.eq.f32.partialorder %v371_v44, 0.0 }
  0xf2   :  { %v300_v52 = vmul.f32 %v268_v49, %v268_v49  ;;  %v316_v53 = vmul.f32 %v284_v46, %v284_v46 }
  0xf4   :  { %v332_v47 = vadd.f32 %v316_v53, %v300_v52 }
  0xf5   :  { %v174_v58 = vpop.f32.mrf.mxu0  ;;  %v249_v54 = vpop.f32.mrf.mxu1 }
  0xf6   :  { %v990_v57 = vpop.eup %989  ;;  %v175_v61 = vadd.f32 %v1206_v22, %v174_v58  ;;  %v250_v62 = vadd.f32 %v1211_v23, %v249_v54  ;;  %vm368_vm11 = vcmp.gt.f32.partialorder %v332_v47, %v356_v60 }
  0xf7   :  { %v384_v59 = vmul.f32 %v990_v57, %v371_v44  ;;  %v372_v55 = vsel %vm368_vm11, %v332_v47, %v356_v60  ;;  %v1307_v56 = vsel %vm368_vm11, %v284_v46, %v364_v8  ;;  %v1310_v5 = vsel %vm368_vm11, %v268_v49, %v1267_v7 }
  0xf8   :  { %v269_v63 = vmax.f32 %v175_v61, 0.0  ;;  %v285_v0 = vmax.f32 %v250_v62, 0.0  ;;  %991 = vrsqrt.f32 %v372_v55  ;;  %vm402_vm0 = vcmp.eq.f32.partialorder %v372_v55, inf }
  0xf9   :  { %v385_v1 = vmul.f32 %v990_v57, %v384_v59  ;;  %v405_v43 = vand.u32 2147483648, %v372_v55  ;;  %vm404_vm1 = vcmp.eq.f32.partialorder %v372_v55, 0.0  ;;  %vm518_vm11 = vcmask 779904  }
  0xfa   :  { %v301_v3 = vmul.f32 %v269_v63, %v269_v63  ;;  %v317_v4 = vmul.f32 %v285_v0, %v285_v0 }
  0xfb   :  { %v386_v6 = vmul.f32 0.5, %v385_v1 }
  0xfc   :  { %v333_v2 = vadd.f32 %v317_v4, %v301_v3 }
  0xfd   :  { %v387_v32 = vsub.f32 1.5, %v386_v6  ;;  %v177_v10 = vpop.f32.mrf.mxu0  ;;  %v252_v11 = vpop.f32.mrf.mxu1 }
  0xfe   :  { %vm369_vm12 = vcmp.gt.f32.partialorder %v333_v2, %v357_v9  ;;  %v178_v8 = vadd.f32 %v1206_v22, %v177_v10  ;;  %v253_v12 = vadd.f32 %v1211_v23, %v252_v11  ;;  %v992_v14 = vpop.eup %991 }
  0xff   :  { %v388_v15 = vmul.f32 %v990_v57, %v387_v32  ;;  %v373_v16 = vsel %vm369_vm12, %v333_v2, %v357_v9  ;;  %v1316_v17 = vsel %vm369_vm12, %v269_v63, %v1276_v18  ;;  %v1319_v7 = vsel %vm369_vm12, %v285_v0, %v1279_v19 }
 0x100   :  { %v396_v20 = vmul.f32 %v992_v14, %v372_v55  ;;  %993 = vrsqrt.f32 %v373_v16  ;;  %v270_v13 = vmax.f32 %v178_v8, 0.0  ;;  %v286_v41 = vmax.f32 %v253_v12, 0.0 }
 0x101   :  { %v389_v21 = vmul.f32 %v388_v15, %v371_v44  ;;  %v358_v19 = vsel %vm354_vm9, %v1281_v26, %v1252_v51  ;;  %vm414_vm3 = vcmp.eq.f32.partialorder %v373_v16, inf  ;;  %v417_v60 = vand.u32 2147483648, %v373_v16 }
 0x102   :  { %v397_v25 = vmul.f32 %v992_v14, %v396_v20  ;;  %v302_v23 = vmul.f32 %v270_v13, %v270_v13  ;;  %v318_v50 = vmul.f32 %v286_v41, %v286_v41  ;;  %vm416_vm4 = vcmp.eq.f32.partialorder %v373_v16, 0.0 }
 0x103   :  { %v391_v22 = vsel %vm390_vm13, %v371_v44, %v389_v21  ;;  %vm492_vm9 = vcmask 517504   ;;  %vm533_vm12 = vcmask 911104   ;;  %vm548_vm13 = vcmask 1042304  }
 0x104   :  { %v394_v27 = vsel %vm392_vm14, %v393_v24, %v391_v22  ;;  %v398_v28 = vmul.f32 0.5, %v397_v25  ;;  %v334_v18 = vadd.f32 %v318_v50, %v302_v23  ;;  %vm870_vm14 = vcmask 523264  }
 0x105   :  { %v431_v29 = vadd.f32 1e-06, %v394_v27 }
 0x106   :  { %v994_v33 = vpop.eup %993  ;;  %v399_v34 = vsub.f32 1.5, %v398_v28  ;;  %vm370_vm15 = vcmp.gt.f32.partialorder %v334_v18, %v358_v19 }
 0x107   :  { %995 = vrcp.f32 %v431_v29  ;;  %v408_v35 = vmul.f32 %v994_v33, %v373_v16  ;;  %v374_v37 = vsel %vm370_vm15, %v334_v18, %v358_v19  ;;  %v1327_v38 = vsel %vm370_vm15, %v286_v41, %v1295_v31 }
 0x108   :  { %v400_v36 = vmul.f32 %v992_v14, %v399_v34  ;;  %v1330_v39 = vsel %vm370_vm15, %v270_v13, %v1290_v30  ;;  %997 = vrsqrt.f32 %v374_v37  ;;  %vm426_vm5 = vcmp.eq.f32.partialorder %v374_v37, inf }
 0x109   :  { %v409_v40 = vmul.f32 %v994_v33, %v408_v35  ;;  %v429_v32 = vand.u32 2147483648, %v374_v37  ;;  %vm428_vm6 = vcmp.eq.f32.partialorder %v374_v37, 0.0 }
 0x10a   :  { %v401_v42 = vmul.f32 %v400_v36, %v372_v55 }
 0x10b   :  { %v410_v44 = vmul.f32 0.5, %v409_v40 }
 0x10c   :  { %v403_v49 = vsel %vm402_vm0, %v372_v55, %v401_v42  ;;  %vm912_vm0 = vcmask 254976  }
 0x10d   :  { %v996_v51 = vpop.eup %995  ;;  %v406_v26 = vsel %vm404_vm1, %v405_v43, %v403_v49  ;;  %v411_v46 = vsub.f32 1.5, %v410_v44 }
 0x10e   :  { %v439_v52 = vmul.f32 %v996_v51, %v394_v27  ;;  %v432_v53 = vadd.f32 1e-06, %v406_v26  ;;  %v998_v47 = vpop.eup %997 }
 0x10f   :  { %v412_v58 = vmul.f32 %v994_v33, %v411_v46  ;;  %v420_v54 = vmul.f32 %v998_v47, %v374_v37 }
 0x110   :  { %v443_v31 = vmul.f32 %v439_v52, %v1300_v45  ;;  %v447_v30 = vmul.f32 %v439_v52, %v1302_v48  ;;  %999 = vrcp.f32 %v432_v53 }
 0x111   :  { %v413_v57 = vmul.f32 %v412_v58, %v373_v16  ;;  %v421_v61 = vmul.f32 %v998_v47, %v420_v54 }
 0x112   :  { %455 = vst.sshfl [vmem:[#allocation1] sm:$0xff pattern:$0x73625140] %v443_v31 }
 0x113   :  { %v415_v62 = vsel %vm414_vm3, %v373_v16, %v413_v57  ;;  %452 = vst.msk [vmem:[#allocation2] sm:$0x3] %vm451_vm2, %v443_v31  ;;  %v422_v55 = vmul.f32 0.5, %v421_v61 }
 0x114   :  { %v418_v59 = vsel %vm416_vm4, %v417_v60, %v415_v62  ;;  %453 = vst.msk [vmem:[#allocation2 + $0x4] sm:$0x3] %vm451_vm2, %v447_v30 }
 0x115   :  { %v433_v63 = vadd.f32 1e-06, %v418_v59  ;;  %v423_v45 = vsub.f32 1.5, %v422_v55  ;;  %v687_v55 = vld [vmem:[%s1708_s5 + $0xf8] sm:$0xff] }
 0x116   :  { %v1000_v0 = vpop.eup %999  ;;  %754 = vmatpush.msra.mxu3 %v687_v55  ;;  %v691_v55 = vld [vmem:[%s1708_s5 + $0x118] sm:$0xff] }
 0x117   :  { %v440_v1 = vmul.f32 %v1000_v0, %v406_v26  ;;  %1001 = vrcp.f32 %v433_v63  ;;  %v424_v48 = vmul.f32 %v998_v47, %v423_v45  ;;  %v670_v63 = vld [vmem:[%s1708_s5 + $0x70] sm:$0xff]  ;;  %v669_v45 = vld [vmem:[%s1708_s5 + $0x68] sm:$0xff] }
 0x118   :  { %v686_v0 = vld [vmem:[%s1708_s5 + $0xf0] sm:$0xff] }
 0x119   :  { %v457_v3 = vld [vmem:[#allocation1 + $0x1] ss:$4 sm:$0xff]  ;;  %v448_v4 = vmul.f32 %v440_v1, %v1307_v56  ;;  %v444_v6 = vmul.f32 %v440_v1, %v1310_v5  ;;  %v425_v2 = vmul.f32 %v424_v48, %v374_v37  ;;  %755 = vmatpush.msra.mxu3 %v686_v0 }
 0x11a   :  { %464 = vst.sshfl [vmem:[#allocation1] sm:$0xff pattern:$0x73625140] %v447_v30  ;;  %458 = vrot.lane.b32.xlu0 %v457_v3, %s1037_s0  ;;  %v685_v1 = vld [vmem:[%s1708_s5 + $0xe8] sm:$0xff]  ;;  %v690_v0 = vld [vmem:[%s1708_s5 + $0x110] sm:$0xff] }
 0x11b   :  { %508 = vrot.lane.b32.xlu1 %v448_v4, %s1038_s3  ;;  %v427_v9 = vsel %vm426_vm5, %v374_v37, %v425_v2  ;;  %756 = vmatpush.msra.mxu3 %v685_v1  ;;  %v667_v2 = vld [vmem:[%s1708_s5 + $0x58] sm:$0xff]  ;;  %v689_v1 = vld [vmem:[%s1708_s5 + $0x108] sm:$0xff] }
 0x11c   :  { %v430_v11 = vsel %vm428_vm6, %v429_v32, %v427_v9  ;;  %v683_v32 = vld [vmem:[%s1708_s5 + $0xd8] sm:$0xff]  ;;  %v666_v9 = vld [vmem:[%s1708_s5 + $0x50] sm:$0xff] }
 0x11d   :  { %v1002_v10 = vpop.eup %1001  ;;  %v434_v12 = vadd.f32 1e-06, %v430_v11 }
 0x11e   :  { %v441_v8 = vmul.f32 %v1002_v10, %v418_v59  ;;  %v671_v59 = vld [vmem:[%s1708_s5 + $0x78] sm:$0xff]  ;;  %v682_v10 = vld [vmem:[%s1708_s5 + $0xd0] sm:$0xff] }
 0x11f   :  { %1003 = vrcp.f32 %v434_v12  ;;  %734 = vmatpush.msra.mxu2 %v671_v59 }
 0x120   :  { %v1340_v14 = vmul.f32 %v441_v8, %v1316_v17  ;;  %v1343_v56 = vmul.f32 %v441_v8, %v1319_v7  ;;  %v681_v8 = vld [vmem:[%s1708_s5 + $0xc8] sm:$0xff] }
 0x121   :  { %v466_v5 = vld [vmem:[#allocation1 + $0x1] ss:$4 sm:$0xff]  ;;  %735 = vmatpush.msra.mxu2 %v670_v63 }
 0x122   :  { %471 = vst.sshfl [vmem:[#allocation1] sm:$0xff pattern:$0x73625140] %v443_v31  ;;  %502 = vrot.lane.b32.xlu0 %v444_v6, %s1038_s3  ;;  %v707_v63 = vld [vmem:[%s1708_s5 + $0x198] sm:$0xff] }
 0x123   :  { %557 = vst.msk [vmem:[#allocation2 + $0x2] sm:$0x3] %vm451_vm2, %v1340_v14  ;;  %736 = vmatpush.msra.mxu2 %v669_v45  ;;  %v706_v45 = vld [vmem:[%s1708_s5 + $0x190] sm:$0xff] }
 0x124   :  { %558 = vst.msk [vmem:[#allocation2 + $0x6] sm:$0x3] %vm451_vm2, %v1343_v56 }
 0x125   :  { %v1004_v15 = vpop.eup %1003 }
 0x126   :  { %v442_v16 = vmul.f32 %v1004_v15, %v430_v11  ;;  %v665_v11 = vld [vmem:[%s1708_s5 + $0x48] sm:$0xff]  ;;  %v679_v15 = vld [vmem:[%s1708_s5 + $0xb8] sm:$0xff] }
 0x128   :  { %v1350_v21 = vmul.f32 %v442_v16, %v1327_v38  ;;  %v1353_v17 = vmul.f32 %v442_v16, %v1330_v39  ;;  %v662_v16 = vld [vmem:[%s1708_s5 + $0x30] sm:$0xff] }
 0x129   :  { %v473_v20 = vld [vmem:[#allocation1 + $0x2] ss:$4 sm:$0xff] }
 0x12a   :  { %479 = vst.sshfl [vmem:[#allocation1] sm:$0xff pattern:$0x73625140] %v447_v30  ;;  %467 = vrot.lane.b32.xlu0 %v466_v5, %s1037_s0  ;;  %474 = vrot.lane.b32.xlu2 %v473_v20, %s1039_s4  ;;  %v663_v5 = vld [vmem:[%s1708_s5 + $0x38] sm:$0xff]  ;;  %v678_v20 = vld [vmem:[%s1708_s5 + $0xb0] sm:$0xff] }
 0x131   :  { %v481_v7 = vld [vmem:[#allocation1 + $0x2] ss:$4 sm:$0xff] }
 0x132   :  { %486 = vst.sshfl [vmem:[#allocation1] sm:$0xff pattern:$0x73625140] %v443_v31  ;;  %609 = vrot.lane.b32.xlu0 %v1350_v21, %s1038_s3  ;;  %604 = vrot.lane.b32.xlu2 %v1353_v17, %s1038_s3 }
 0x139   :  { %v488_v13 = vld [vmem:[#allocation1 + $0x3] ss:$4 sm:$0xff] }
 0x13a   :  { %494 = vst.sshfl [vmem:[#allocation1] sm:$0xff pattern:$0x73625140] %v447_v30  ;;  %482 = vrot.lane.b32.xlu2 %v481_v7, %s1039_s4  ;;  %v660_v7 = vld [vmem:[%s1708_s5 + $0x20] sm:$0xff] }
 0x141   :  { %v496_v41 = vld [vmem:[#allocation1 + $0x3] ss:$4 sm:$0xff] }
 0x142   :  { %512 = vst.sshfl [vmem:[#allocation1] sm:$0xff pattern:$0x73625140] %v444_v6  ;;  %489 = vrot.lane.b32.xlu2 %v488_v13, %s1040_s23  ;;  %497 = vrot.lane.b32.xlu0 %v496_v41, %s1040_s23  ;;  %v676_v13 = vld [vmem:[%s1708_s5 + $0xa0] sm:$0xff]  ;;  %v659_v41 = vld [vmem:[%s1708_s5 + $0x18] sm:$0xff] }
 0x149   :  { %v514_v24 = vld [vmem:[#allocation1 + $0x1] ss:$4 sm:$0xff] }
 0x14a   :  { %520 = vst.sshfl [vmem:[#allocation1] sm:$0xff pattern:$0x73625140] %v448_v4  ;;  %515 = vrot.lane.b32.xlu1 %v514_v24, %s1041_s24  ;;  %v675_v24 = vld [vmem:[%s1708_s5 + $0x98] sm:$0xff] }
 0x151   :  { %v522_v25 = vld [vmem:[#allocation1 + $0x1] ss:$4 sm:$0xff] }
 0x152   :  { %527 = vst.sshfl [vmem:[#allocation1] sm:$0xff pattern:$0x73625140] %v444_v6  ;;  %523 = vrot.lane.b32.xlu2 %v522_v25, %s1041_s24  ;;  %v658_v25 = vld [vmem:[%s1708_s5 + $0x10] sm:$0xff] }
 0x159   :  { %v529_v22 = vld [vmem:[#allocation1 + $0x2] ss:$4 sm:$0xff] }
 0x15a   :  { %530 = vrot.lane.b32.xlu2 %v529_v22, %s1042_s25  ;;  %535 = vst.sshfl [vmem:[#allocation1] sm:$0xff pattern:$0x73625140] %v448_v4  ;;  %v674_v22 = vld [vmem:[%s1708_s5 + $0x90] sm:$0xff] }
 0x161   :  { %v537_v23 = vld [vmem:[#allocation1 + $0x2] ss:$4 sm:$0xff] }
 0x162   :  { %538 = vrot.lane.b32.xlu0 %v537_v23, %s1042_s25  ;;  %542 = vst.sshfl [vmem:[#allocation1] sm:$0xff pattern:$0x73625140] %v444_v6  ;;  %v684_v6 = vld [vmem:[%s1708_s5 + $0xe0] sm:$0xff]  ;;  %v657_v23 = vld [vmem:[%s1708_s5 + $0x8] sm:$0xff] }
 0x163   :  { %757 = vmatpush.msra.mxu3 %v684_v6 }
 0x165   :  { %758 = vmatpush.msra.mxu3 %v683_v32  ;;  %v831_v32 = vld [vmem:[%s1710_s7 + $0x78] sm:$0xff] }
 0x167   :  { %759 = vmatpush.msra.mxu3 %v682_v10 }
 0x169   :  { %v544_v50 = vld [vmem:[#allocation1 + $0x3] ss:$4 sm:$0xff]  ;;  %760 = vmatpush.msra.mxu3 %v681_v8 }
 0x16a   :  { %545 = vrot.lane.b32.xlu0 %v544_v50, %s1043_s26  ;;  %550 = vst.sshfl [vmem:[#allocation1] sm:$0xff pattern:$0x73625140] %v448_v4  ;;  %v668_v4 = vld [vmem:[%s1708_s5 + $0x60] sm:$0xff]  ;;  %v673_v50 = vld [vmem:[%s1708_s5 + $0x88] sm:$0xff] }
 0x16b   :  { %737 = vmatpush.msra.mxu2 %v668_v4  ;;  %v704_v4 = vld [vmem:[%s1708_s5 + $0x180] sm:$0xff]  ;;  %v829_v8 = vld [vmem:[%s1710_s7 + $0x68] sm:$0xff] }
 0x16d   :  { %738 = vmatpush.msra.mxu2 %v667_v2 }
 0x16f   :  { %739 = vmatpush.msra.mxu2 %v666_v9 }
 0x171   :  { %v552_v27 = vld [vmem:[#allocation1 + $0x3] ss:$4 sm:$0xff]  ;;  %740 = vmatpush.msra.mxu2 %v665_v11 }
 0x172   :  { %560 = vst.sshfl [vmem:[#allocation1] sm:$0xff pattern:$0x73625140] %v1340_v14  ;;  %v830_v11 = vld [vmem:[%s1710_s7 + $0x70] sm:$0xff] }
 0x179   :  { %v562_v28 = vld [vmem:[#allocation1 + $0x1] ss:$4 sm:$0xff] }
 0x17a   :  { %563 = vrot.lane.b32.xlu1 %v562_v28, %s1037_s0  ;;  %568 = vst.sshfl [vmem:[#allocation1] sm:$0xff pattern:$0x73625140] %v1343_v56  ;;  %v656_v28 = vld [vmem:[%s1708_s5] sm:$0xff] }
 0x181   :  { %v570_v29 = vld [vmem:[#allocation1 + $0x1] ss:$4 sm:$0xff] }
 0x182   :  { %571 = vrot.lane.b32.xlu1 %v570_v29, %s1037_s0  ;;  %575 = vst.sshfl [vmem:[#allocation1] sm:$0xff pattern:$0x73625140] %v1340_v14  ;;  %v672_v29 = vld [vmem:[%s1708_s5 + $0x80] sm:$0xff] }
 0x184   :  { %v475_v18 = vpop.permute.xlu2 %474 }
 0x189   :  { %v577_v33 = vld [vmem:[#allocation1 + $0x2] ss:$4 sm:$0xff] }
 0x18a   :  { %578 = vrot.lane.b32.xlu0 %v577_v33, %s1039_s4  ;;  %582 = vst.sshfl [vmem:[#allocation1] sm:$0xff pattern:$0x73625140] %v1343_v56  ;;  %v719_v33 = vld [vmem:[%s1708_s5 + $0x1f8] sm:$0xff] }
 0x18c   :  { %v459_v34 = vpop.permute.xlu0 %458  ;;  %v1374_v19 = vpop.permute.xlu2 %604 }
 0x18d   :  { %462 = vst.msk [vmem:[#allocation2] sm:$0x3] %vm461_vm7, %v459_v34  ;;  %v509_v26 = vpop.permute.xlu1 %508  ;;  %v702_v34 = vld [vmem:[%s1708_s5 + $0x170] sm:$0xff] }
 0x18e   :  { %478 = vst.msk [vmem:[#allocation2] sm:$0x3] %vm477_vm8, %v475_v18  ;;  %v703_v18 = vld [vmem:[%s1708_s5 + $0x178] sm:$0xff] }
 0x191   :  { %v584_v35 = vld [vmem:[#allocation1 + $0x2] ss:$4 sm:$0xff] }
 0x192   :  { %585 = vrot.lane.b32.xlu1 %v584_v35, %s1039_s4  ;;  %589 = vst.sshfl [vmem:[#allocation1] sm:$0xff pattern:$0x73625140] %v1340_v14  ;;  %v664_v14 = vld [vmem:[%s1708_s5 + $0x40] sm:$0xff]  ;;  %v701_v35 = vld [vmem:[%s1708_s5 + $0x168] sm:$0xff] }
 0x193   :  { %741 = vmatpush.msra.mxu2 %v664_v14  ;;  %v827_v14 = vld [vmem:[%s1710_s7 + $0x58] sm:$0xff] }
 0x194   :  { %v503_v36 = vpop.permute.xlu0 %502  ;;  %v483_v37 = vpop.permute.xlu2 %482 }
 0x195   :  { %742 = vmatpush.msra.mxu2 %v663_v5 }
 0x197   :  { %743 = vmatpush.msra.mxu2 %v662_v16  ;;  %v825_v16 = vld [vmem:[%s1710_s7 + $0x48] sm:$0xff] }
 0x199   :  { %v591_v38 = vld [vmem:[#allocation1 + $0x3] ss:$4 sm:$0xff] }
 0x19a   :  { %592 = vrot.lane.b32.xlu1 %v591_v38, %s1040_s23  ;;  %596 = vst.sshfl [vmem:[#allocation1] sm:$0xff pattern:$0x73625140] %v1343_v56  ;;  %v680_v56 = vld [vmem:[%s1708_s5 + $0xc0] sm:$0xff] }
 0x19b   :  { %761 = vmatpush.msra.mxu3 %v680_v56  ;;  %v700_v38 = vld [vmem:[%s1708_s5 + $0x160] sm:$0xff] }
 0x19c   :  { %v468_v39 = vpop.permute.xlu0 %467  ;;  %v490_v40 = vpop.permute.xlu2 %489 }
 0x19d   :  { %470 = vst.msk [vmem:[#allocation2 + $0x4] sm:$0x3] %vm461_vm7, %v468_v39  ;;  %762 = vmatpush.msra.mxu3 %v679_v15  ;;  %v716_v39 = vld [vmem:[%s1708_s5 + $0x1e0] sm:$0xff]  ;;  %v826_v15 = vld [vmem:[%s1710_s7 + $0x50] sm:$0xff] }
 0x19e   :  { %493 = vst.msk [vmem:[#allocation2] sm:$0x3] %vm492_vm9, %v490_v40 }
 0x19f   :  { %485 = vst.msk [vmem:[#allocation2 + $0x4] sm:$0x3] %vm477_vm8, %v483_v37  ;;  %763 = vmatpush.msra.mxu3 %v678_v20  ;;  %v824_v20 = vld [vmem:[%s1710_s7 + $0x40] sm:$0xff] }
 0x1a0   :  { %506 = vst.msk [vmem:[#allocation2] sm:$0x3] %vm505_vm10, %v503_v36  ;;  %v717_v36 = vld [vmem:[%s1708_s5 + $0x1e8] sm:$0xff] }
 0x1a1   :  { %v598_v42 = vld [vmem:[#allocation1 + $0x3] ss:$4 sm:$0xff] }
 0x1a2   :  { %599 = vrot.lane.b32.xlu2 %v598_v42, %s1040_s23  ;;  %613 = vst.sshfl [vmem:[#allocation1] sm:$0xff pattern:$0x73625140] %v1353_v17  ;;  %v699_v42 = vld [vmem:[%s1708_s5 + $0x158] sm:$0xff] }
 0x1a4   :  { %v610_v44 = vpop.permute.xlu0 %609 }
 0x1a9   :  { %v615_v43 = vld [vmem:[#allocation1 + $0x1] ss:$4 sm:$0xff] }
 0x1aa   :  { %616 = vrot.lane.b32.xlu0 %v615_v43, %s1041_s24  ;;  %620 = vst.sshfl [vmem:[#allocation1] sm:$0xff pattern:$0x73625140] %v1350_v21  ;;  %v715_v43 = vld [vmem:[%s1708_s5 + $0x1d8] sm:$0xff] }
 0x1ac   :  { %v524_v51 = vpop.permute.xlu2 %523 }
 0x1b1   :  { %v622_v49 = vld [vmem:[#allocation1 + $0x1] ss:$4 sm:$0xff] }
 0x1b2   :  { %623 = vrot.lane.b32.xlu1 %v622_v49, %s1041_s24  ;;  %627 = vst.sshfl [vmem:[#allocation1] sm:$0xff pattern:$0x73625140] %v1353_v17  ;;  %v714_v49 = vld [vmem:[%s1708_s5 + $0x1d0] sm:$0xff] }
 0x1b4   :  { %v498_v46 = vpop.permute.xlu0 %497  ;;  %v531_v47 = vpop.permute.xlu2 %530 }
 0x1b5   :  { %500 = vst.msk [vmem:[#allocation2 + $0x4] sm:$0x3] %vm492_vm9, %v498_v46  ;;  %v696_v46 = vld [vmem:[%s1708_s5 + $0x140] sm:$0xff] }
 0x1b6   :  { %511 = vst.msk [vmem:[#allocation2 + $0x4] sm:$0x3] %vm505_vm10, %v509_v26  ;;  %v713_v26 = vld [vmem:[%s1708_s5 + $0x1c8] sm:$0xff] }
 0x1b7   :  { %526 = vst.msk [vmem:[#allocation2 + $0x4] sm:$0x3] %vm518_vm11, %v524_v51  ;;  %v697_v51 = vld [vmem:[%s1708_s5 + $0x148] sm:$0xff] }
 0x1b9   :  { %v629_v52 = vld [vmem:[#allocation1 + $0x2] ss:$4 sm:$0xff] }
 0x1ba   :  { %630 = vrot.lane.b32.xlu1 %v629_v52, %s1042_s25  ;;  %634 = vst.sshfl [vmem:[#allocation1] sm:$0xff pattern:$0x73625140] %v1350_v21  ;;  %v712_v52 = vld [vmem:[%s1708_s5 + $0x1c0] sm:$0xff] }
 0x1bc   :  { %v516_v53 = vpop.permute.xlu1 %515 }
 0x1bd   :  { %519 = vst.msk [vmem:[#allocation2] sm:$0x3] %vm518_vm11, %v516_v53 }
 0x1be   :  { %534 = vst.msk [vmem:[#allocation2] sm:$0x3] %vm533_vm12, %v531_v47 }
 0x1c1   :  { %v636_v58 = vld [vmem:[#allocation1 + $0x2] ss:$4 sm:$0xff] }
 0x1c2   :  { %553 = vrot.lane.b32.xlu1 %v552_v27, %s1043_s26  ;;  %637 = vrot.lane.b32.xlu2 %v636_v58, %s1042_s25  ;;  %641 = vst.sshfl [vmem:[#allocation1] sm:$0xff pattern:$0x73625140] %v1353_v17  ;;  %v677_v17 = vld [vmem:[%s1708_s5 + $0xa8] sm:$0xff]  ;;  %v695_v58 = vld [vmem:[%s1708_s5 + $0x138] sm:$0xff] }
 0x1c3   :  { %764 = vmatpush.msra.mxu3 %v677_v17  ;;  %v822_v17 = vld [vmem:[%s1710_s7 + $0x30] sm:$0xff] }
 0x1c5   :  { %765 = vmatpush.msra.mxu3 %v676_v13  ;;  %v820_v13 = vld [vmem:[%s1710_s7 + $0x20] sm:$0xff] }
 0x1c7   :  { %766 = vmatpush.msra.mxu3 %v675_v24  ;;  %v818_v24 = vld [vmem:[%s1710_s7 + $0x10] sm:$0xff] }
 0x1c9   :  { %v643_v31 = vld [vmem:[#allocation1 + $0x3] ss:$4 sm:$0xff]  ;;  %767 = vmatpush.msra.mxu3 %v674_v22 }
 0x1ca   :  { %644 = vrot.lane.b32.xlu2 %v643_v31, %s1043_s26  ;;  %648 = vst.sshfl [vmem:[#allocation1] sm:$0xff pattern:$0x73625140] %v1350_v21  ;;  %v661_v21 = vld [vmem:[%s1708_s5 + $0x28] sm:$0xff]  ;;  %v711_v31 = vld [vmem:[%s1708_s5 + $0x1b8] sm:$0xff]  ;;  %v816_v22 = vld [vmem:[%s1710_s7] sm:$0xff] }
 0x1cb   :  { %744 = vmatpush.msra.mxu2 %v661_v21  ;;  %768 = vmatpush.msra.mxu3 %v673_v50  ;;  %v823_v21 = vld [vmem:[%s1710_s7 + $0x38] sm:$0xff]  ;;  %v864_v50 = vld [vmem:[%s1712_s9 + $0x30] sm:$0xff] }
 0x1cd   :  { %745 = vmatpush.msra.mxu2 %v660_v7  ;;  %769 = vmatpush.msra.mxu3 %v672_v29  ;;  %v821_v7 = vld [vmem:[%s1710_s7 + $0x28] sm:$0xff]  ;;  %v986_v29 = vld [vmem:[%s1709_s6] ss:$0 sm:$0xff] }
 0x1cf   :  { %746 = vmatpush.msra.mxu2 %v659_v41  ;;  %794 = vmatpush.msrb.mxu3 %v719_v33  ;;  %v819_v41 = vld [vmem:[%s1710_s7 + $0x18] sm:$0xff] }
 0x1d1   :  { %v650_v30 = vld [vmem:[#allocation1 + $0x3] ss:$4 sm:$0xff]  ;;  %747 = vmatpush.msra.mxu2 %v658_v25 }
 0x1d2   :  { %651 = vrot.lane.b32.xlu0 %v650_v30, %s1043_s26  ;;  %v694_v30 = vld [vmem:[%s1708_s5 + $0x130] sm:$0xff]  ;;  %v817_v25 = vld [vmem:[%s1710_s7 + $0x8] sm:$0xff] }
 0x1d3   :  { %748 = vmatpush.msra.mxu2 %v657_v23  ;;  %v865_v23 = vld [vmem:[%s1712_s9 + $0x38] sm:$0xff] }
 0x1d4   :  { %v539_v54 = vpop.permute.xlu0 %538 }
 0x1d5   :  { %541 = vst.msk [vmem:[#allocation2 + $0x4] sm:$0x3] %vm533_vm12, %v539_v54  ;;  %749 = vmatpush.msra.mxu2 %v656_v28  ;;  %v710_v54 = vld [vmem:[%s1708_s5 + $0x1b0] sm:$0xff]  ;;  %v862_v28 = vld [vmem:[%s1712_s9 + $0x20] sm:$0xff] }
 0x1d7   :  { %774 = vmatpush.msrb.mxu2 %v703_v18 }
 0x1d9   :  { %775 = vmatpush.msrb.mxu2 %v702_v34 }
 0x1db   :  { %776 = vmatpush.msrb.mxu2 %v701_v35 }
 0x1dc   :  { %v546_v57 = vpop.permute.xlu0 %545 }
 0x1dd   :  { %549 = vst.msk [vmem:[#allocation2] sm:$0x3] %vm548_vm13, %v546_v57  ;;  %777 = vmatpush.msrb.mxu2 %v700_v38  ;;  %v693_v57 = vld [vmem:[%s1708_s5 + $0x128] sm:$0xff] }
 0x1df   :  { %778 = vmatpush.msrb.mxu2 %v699_v42  ;;  %v861_v42 = vld [vmem:[%s1712_s9 + $0x18] sm:$0xff] }
 0x1ec   :  { %v564_v60 = vpop.permute.xlu1 %563 }
 0x1ed   :  { %566 = vst.msk [vmem:[#allocation2 + $0x2] sm:$0x3] %vm461_vm7, %v564_v60  ;;  %v709_v60 = vld [vmem:[%s1708_s5 + $0x1a8] sm:$0xff] }
 0x1f4   :  { %v572_v61 = vpop.permute.xlu1 %571 }
 0x1f5   :  { %574 = vst.msk [vmem:[#allocation2 + $0x6] sm:$0x3] %vm461_vm7, %v572_v61  ;;  %v692_v61 = vld [vmem:[%s1708_s5 + $0x120] sm:$0xff] }
 0x1fc   :  { %v579_v62 = vpop.permute.xlu0 %578  ;;  %v600_v3 = vpop.permute.xlu2 %599 }
 0x1fd   :  { %581 = vst.msk [vmem:[#allocation2 + $0x2] sm:$0x3] %vm477_vm8, %v579_v62  ;;  %v708_v62 = vld [vmem:[%s1708_s5 + $0x1a0] sm:$0xff] }
 0x204   :  { %v586_v48 = vpop.permute.xlu1 %585 }
 0x205   :  { %588 = vst.msk [vmem:[#allocation2 + $0x6] sm:$0x3] %vm477_vm8, %v586_v48  ;;  %v705_v48 = vld [vmem:[%s1708_s5 + $0x188] sm:$0xff] }
 0x206   :  { %602 = vst.msk [vmem:[#allocation2 + $0x6] sm:$0x3] %vm492_vm9, %v600_v3  ;;  %v688_v3 = vld [vmem:[%s1708_s5 + $0x100] sm:$0xff] }
 0x207   :  { %612 = vst.msk [vmem:[#allocation2 + $0x6] sm:$0x3] %vm505_vm10, %v610_v44  ;;  %v698_v44 = vld [vmem:[%s1708_s5 + $0x150] sm:$0xff] }
 0x208   :  { %779 = vmatpush.msrb.mxu2 %v698_v44  ;;  %v859_v44 = vld [vmem:[%s1712_s9 + $0x8] sm:$0xff] }
 0x20a   :  { %780 = vmatpush.msrb.mxu2 %v697_v51  ;;  %v987_v51 = vld [vmem:[%s1711_s8] ss:$0 sm:$0xff]  ;;  %s1044_s8 = smov [#allocation3]  }
 0x20c   :  { %v593_v12 = vpop.permute.xlu1 %592  ;;  %781 = vmatpush.msrb.mxu2 %v696_v46 }
 0x20d   :  { %595 = vst.msk [vmem:[#allocation2 + $0x2] sm:$0x3] %vm492_vm9, %v593_v12  ;;  %v828_v12 = vld [vmem:[%s1710_s7 + $0x60] sm:$0xff] }
 0x20e   :  { %607 = vst.msk [vmem:[#allocation2 + $0x2] sm:$0x3] %vm505_vm10, %v1374_v19  ;;  %v718_v19 = vld [vmem:[%s1708_s5 + $0x1f0] sm:$0xff]  ;;  %782 = vmatpush.msrb.mxu2 %v695_v58  ;;  %s932_s5 = sshll.u32 %s1714_s11, 4  ;;  %s933_s5 = int_to_ptr.hbm [resolvable:$true] %s932_s5 }
 0x20f   :  { %795 = vmatpush.msrb.mxu3 %v718_v19 }
 0x210   :  { %783 = vmatpush.msrb.mxu2 %v694_v30 }
 0x211   :  { %796 = vmatpush.msrb.mxu3 %v717_v36 }
 0x212   :  { %784 = vmatpush.msrb.mxu2 %v693_v57 }
 0x213   :  { %797 = vmatpush.msrb.mxu3 %v716_v39 }
 0x214   :  { %785 = vmatpush.msrb.mxu2 %v692_v61 }
 0x215   :  { %798 = vmatpush.msrb.mxu3 %v715_v43  ;;  %v860_v43 = vld [vmem:[%s1712_s9 + $0x10] sm:$0xff] }
 0x216   :  { %786 = vmatpush.msrb.mxu2 %v691_v55 }
 0x217   :  { %799 = vmatpush.msrb.mxu3 %v714_v49  ;;  %v858_v49 = vld [vmem:[%s1712_s9] sm:$0xff] }
 0x218   :  { %787 = vmatpush.msrb.mxu2 %v690_v0 }
 0x219   :  { %800 = vmatpush.msrb.mxu3 %v713_v26 }
 0x21a   :  { %788 = vmatpush.msrb.mxu2 %v689_v1 }
 0x21b   :  { %801 = vmatpush.msrb.mxu3 %v712_v52 }
 0x21c   :  { %v617_v27 = vpop.permute.xlu0 %616  ;;  %v638_v37 = vpop.permute.xlu2 %637  ;;  %789 = vmatpush.msrb.mxu2 %v688_v3 }
 0x21d   :  { %619 = vst.msk [vmem:[#allocation2 + $0x2] sm:$0x3] %vm518_vm11, %v617_v27  ;;  %802 = vmatpush.msrb.mxu3 %v711_v31  ;;  %v863_v27 = vld [vmem:[%s1712_s9 + $0x28] sm:$0xff]  ;;  %s930_s9 = sshll.u32 %s1044_s8, 4  ;;  %s931_s9 = int_to_ptr.vmem [resolvable:$true] %s930_s9 }
 0x21f   :  { %803 = vmatpush.msrb.mxu3 %v710_v54 }
 0x221   :  { %804 = vmatpush.msrb.mxu3 %v709_v60 }
 0x223   :  { %805 = vmatpush.msrb.mxu3 %v708_v62 }
 0x224   :  { %v624_v40 = vpop.permute.xlu1 %623  ;;  %v645_v47 = vpop.permute.xlu2 %644 }
 0x225   :  { %626 = vst.msk [vmem:[#allocation2 + $0x6] sm:$0x3] %vm518_vm11, %v624_v40  ;;  %806 = vmatpush.msrb.mxu3 %v707_v63 }
 0x226   :  { %640 = vst.msk [vmem:[#allocation2 + $0x6] sm:$0x3] %vm533_vm12, %v638_v37 }
 0x227   :  { %807 = vmatpush.msrb.mxu3 %v706_v45 }
 0x229   :  { %808 = vmatpush.msrb.mxu3 %v705_v48 }
 0x22b   :  { %809 = vmatpush.msrb.mxu3 %v704_v4 }
 0x22c   :  { %v631_v53 = vpop.permute.xlu1 %630 }
 0x22d   :  { %633 = vst.msk [vmem:[#allocation2 + $0x2] sm:$0x3] %vm533_vm12, %v631_v53 }
 0x22e   :  { %647 = vst.msk [vmem:[#allocation2 + $0x2] sm:$0x3] %vm548_vm13, %v645_v47  ;;  %v988_v47 = vld [vmem:[%s1713_s10] ss:$0 sm:$0xff] }
 0x234   :  { %v554_v59 = vpop.permute.xlu1 %553 }
 0x235   :  { %556 = vst.msk [vmem:[#allocation2 + $0x4] sm:$0x3] %vm548_vm13, %v554_v59 }
 0x244   :  { %v652_v6 = vpop.permute.xlu0 %651 }
 0x245   :  { %654 = vst.msk [vmem:[#allocation2 + $0x6] sm:$0x3] %vm548_vm13, %v652_v6 }
 0x24c   :  { %v655_v2 = vld [vmem:[#allocation2] sm:$0xff] }
 0x24d   :  { %725 = vst [vmem:[#allocation1] ss:$4 sm:$0xff] %v655_v2 }
 0x254   :  { %v726_v9 = vld.sshfl [vmem:[#allocation1] sm:$0xff pattern:$0x73625140]  ;;  %v727_v10 = vld.sshfl [vmem:[#allocation1 + $0x8] sm:$0xff pattern:$0x73625140] }
 0x255   :  { %750 = vmatmul.f32.vlgmr.msra.gmra.mxu2 %v726_v9  ;;  %770 = vmatmul.f32.vlgmr.msra.gmra.mxu3 %v727_v10  ;;  %v728_v56 = vld.sshfl [vmem:[#allocation1 + $0x10] sm:$0xff pattern:$0x73625140]  ;;  %v729_v5 = vld.sshfl [vmem:[#allocation1 + $0x18] sm:$0xff pattern:$0x73625140] }
 0x256   :  { %836 = vmatpush.msra.mxu2 %v831_v32  ;;  %882 = vmatpush.msra.mxu3 %v865_v23 }
 0x258   :  { %837 = vmatpush.msra.mxu2 %v830_v11  ;;  %883 = vmatpush.msra.mxu3 %v864_v50 }
 0x25a   :  { %838 = vmatpush.msra.mxu2 %v829_v8  ;;  %884 = vmatpush.msra.mxu3 %v863_v27 }
 0x25c   :  { %839 = vmatpush.msra.mxu2 %v828_v12  ;;  %885 = vmatpush.msra.mxu3 %v862_v28 }
 0x25d   :  { %790 = vmatmul.f32.vlgmr.msrb.gmra.mxu2 %v728_v56  ;;  %810 = vmatmul.f32.vlgmr.msrb.gmra.mxu3 %v729_v5 }
 0x25e   :  { %840 = vmatpush.msra.mxu2 %v827_v14  ;;  %886 = vmatpush.msra.mxu3 %v861_v42 }
 0x260   :  { %841 = vmatpush.msra.mxu2 %v826_v15  ;;  %887 = vmatpush.msra.mxu3 %v860_v43 }
 0x262   :  { %842 = vmatpush.msra.mxu2 %v825_v16  ;;  %888 = vmatpush.msra.mxu3 %v859_v44 }
 0x264   :  { %843 = vmatpush.msra.mxu2 %v824_v20  ;;  %889 = vmatpush.msra.mxu3 %v858_v49 }
 0x266   :  { %844 = vmatpush.msra.mxu2 %v823_v21 }
 0x268   :  { %845 = vmatpush.msra.mxu2 %v822_v17 }
 0x26a   :  { %846 = vmatpush.msra.mxu2 %v821_v7 }
 0x26c   :  { %847 = vmatpush.msra.mxu2 %v820_v13 }
 0x26e   :  { %848 = vmatpush.msra.mxu2 %v819_v41 }
 0x270   :  { %849 = vmatpush.msra.mxu2 %v818_v24 }
 0x272   :  { %850 = vmatpush.msra.mxu2 %v817_v25 }
 0x274   :  { %851 = vmatpush.msra.mxu2 %v816_v22 }
 0x2d8   :  { %v751_v18 = vpop.f32.mrf.mxu2  ;;  %v771_v33 = vpop.f32.mrf.mxu3 }
 0x2d9   :  { %v752_v34 = vadd.f32 %v986_v29, %v751_v18 }
 0x2db   :  { %v772_v19 = vadd.f32 %v771_v33, %v752_v34 }
 0x2e0   :  { %v791_v35 = vpop.f32.mrf.mxu2  ;;  %v811_v37 = vpop.f32.mrf.mxu3 }
 0x2e1   :  { %v792_v36 = vadd.f32 %v791_v35, %v772_v19 }
 0x2e3   :  { %v812_v38 = vadd.f32 %v811_v37, %v792_v36 }
 0x2e5   :  { %v814_v39 = vmax.f32 %v812_v38, 0.0 }
 0x2e7   :  { %v815_v40 = vmul.f32 1.1111112, %v814_v39 }
 0x2e9   :  { %852 = vmatmul.f32.vlgmr.msra.gmra.mxu2 %v815_v40 }
 0x36c   :  { %v853_v26 = vpop.f32.mrf.mxu2 }
 0x36d   :  { %v854_v46 = vadd.f32 %v987_v51, %v853_v26 }
 0x36f   :  { %v856_v52 = vmax.f32 %v854_v46, 0.0 }
 0x371   :  { %v857_v53 = vmul.f32 1.1111112, %v856_v52 }
 0x373   :  { %975 = vmatmul.msk.f32.vlgmr.msra.gmra.mxu3 %vm870_vm14, %v857_v53 }
 0x3f6   :  { %v891_v58 = vpop.f32.mrf.mxu3 }
 0x3f7   :  { %v892_v31 = vadd.f32 %v988_v47, %v891_v58 }
 0x3f9   :  { %v894_v30 = vmul.f32 %v892_v31, %v892_v31 }
 0x3fb   :  { %896 = vrot.lane.b32.xlu1 %v894_v30, %s1042_s25 }
 0x46d   :  { %v897_v54 = vpop.permute.xlu1 %896 }
 0x46e   :  { %v899_v57 = vadd.f32 %v897_v54, %v894_v30 }
 0x470   :  { %1005 = vrsqrt.f32 %v899_v57  ;;  %vm907_vm15 = vcmp.eq.f32.partialorder %v899_v57, inf  ;;  %v910_v45 = vand.u32 2147483648, %v899_v57  ;;  %vm909_vm1 = vcmp.eq.f32.partialorder %v899_v57, 0.0 }
 0x476   :  { %v1006_v60 = vpop.eup %1005 }
 0x477   :  { %v901_v61 = vmul.f32 %v1006_v60, %v899_v57 }
 0x479   :  { %v902_v62 = vmul.f32 %v1006_v60, %v901_v61 }
 0x47b   :  { %v903_v59 = vmul.f32 0.5, %v902_v62 }
 0x47d   :  { %v904_v55 = vsub.f32 1.5, %v903_v59 }
 0x47f   :  { %v905_v63 = vmul.f32 %v1006_v60, %v904_v55 }
 0x481   :  { %v906_v0 = vmul.f32 %v905_v63, %v899_v57 }
 0x483   :  { %v908_v1 = vsel %vm907_vm15, %v899_v57, %v906_v0 }
 0x484   :  { %v911_v48 = vsel %vm909_vm1, %v910_v45, %v908_v1 }
 0x485   :  { %v913_v3 = vsel %vm912_vm0, %v911_v48, -inf }
 0x486   :  { %914 = vmax.xlane.f32.xlu2 %v913_v3 }
 0x4f9   :  { %v915_v4 = vpop.xlane.xlu2 %914 }
 0x4fa   :  { %v916_v6 = vsub.f32 %v911_v48, %v915_v4 }
 0x4fc   :  { %v917_v2 = vmul.f32 1.442695, %v916_v6 }
 0x4fe   :  { %1007 = vpow2.f32 %v917_v2 }
 0x504   :  { %v1008_v32 = vpop.eup %1007 }
 0x505   :  { %v919_v9 = vsel %vm912_vm0, %v1008_v32, 0.0 }
 0x506   :  { %920 = vadd.xlane.f32.xlu0 %v919_v9 }
 0x579   :  { %v921_v10 = vpop.xlane.xlu0 %920 }
 0x57a   :  { %1009 = vrcp.f32 %v921_v10 }
 0x580   :  { %v1010_v11 = vpop.eup %1009 }
 0x581   :  { %v923_v8 = vmul.f32 %v1010_v11, %v1008_v32 }
 0x583   :  { %924 = vst.msk [vmem:[#allocation3] sm:$0x3] %vm912_vm0, %v923_v8 }
 0x584   :  { %935 = dma.vmem_to_hbm [thread:$0]  %s931_s9, 32, %s933_s5, [#allocation4]  }
 0x585   :  { %1035 = dma.done.wait [#allocation4], 32  }
 0x586   :  { %1036 = vsyncadd [#allocation4], 4294967264 }
 0x587   :  { %940 = vsyncpa [#allocation4], 1 }

</bundles_post_ra>
